<compile_context>
chip_gen: v6e
topology: v6e:2x2x1
jax: 0.10.0
libtpu: 0.0.40
codegen_flags: <defaults>
</compile_context>

<pallas_src>
import jax
import jax.numpy as jnp
from jax import lax
from jax.experimental import pallas as pl
from jax.experimental.pallas import tpu as pltpu

# ---------------- configuration (matches ConjointCNNModule defaults) ----------
H1 = 45            # hidden_channels1
H2 = 65            # hidden_channels2
K1 = 6             # filter_width1
K2 = 5             # filter_width2
POOL = 2           # maxpool_width
CB_OUT = 2         # convblock_out_nodes
HIDDEN_DENSE = 64  # hidden_dense
NEG_SLOPE = 0.01   # F.leaky_relu default
EPS = 1e-5         # batch-norm eps
B = 2              # batch size
L = 40             # sequence length: chosen so the conv/pool chain ends at length 1,
                   # which the ConvBlock's flatten -> Linear(H1, CB_OUT) implicitly requires.

L1 = L - K1 + 1        # 35  after conv1
P1 = L1 // POOL        # 17  after maxpool1
L2 = P1 - K2 + 1       # 13  after conv2
P2 = L2 // POOL        # 6   after maxpool2
L3 = P2 - K1 + 1       # 1   after conv3
assert L3 == 1, "ConvBlock's Linear(H1, CB_OUT) requires the final length to be 1"


def _leaky(x):
    return jnp.where(x > 0, x, NEG_SLOPE * x)


def _bn_rows(x):
    """Training-mode batch norm per column (channel) over all rows, no affine.

    Rows carry batch*length folded together, so this equals BatchNorm1d over (N, L)
    per channel.  TODO(synk): the reference calls F.batch_norm(out) with no running
    stats (broken as written in PyTorch); this is the closest well-defined semantics.
    """
    mean = jnp.mean(x, axis=0, keepdims=True)
    d = x - mean
    var = jnp.mean(d * d, axis=0, keepdims=True)
    return d * lax.rsqrt(var + EPS)          # rsqrt -> EUP slot


# ------------------------------- fused kernel ---------------------------------
def fused_kernel(xp_ref, xr_ref,
                 pw1_ref, pb1_ref, pw2_ref, pb2_ref, pw3_ref, pb3_ref, pwo_ref, pbo_ref,
                 rw1_ref, rb1_ref, rw2_ref, rb2_ref, rw3_ref, rb3_ref, rwo_ref, rbo_ref,
                 wd_ref, bd_ref, wh_ref, bh_ref,
                 out_ref, s1_ref, s2_ref):
    # xp_ref/xr_ref : (B*L1, K1)   conv1 im2col of the single-channel inputs
    # *w1 : (K1, H1)        conv1 weight (Cin=1 folded into K)
    # *w2 : (K2*H1, H2)     conv2 weight, im2col-flattened (k*H1 + cin, cout)
    # *w3 : (K1*H2, H1)     conv3 weight, im2col-flattened (k*H2 + cin, cout)
    # *wo : (H1, CB_OUT)    ConvBlock output Linear
    # wd/wh : head Linear weights;  biases are (1, C)
    # s1_ref : (B*L1, H1) scratch, s2_ref : (B*L2, H2) scratch (reused by both branches)

    def maxpool_rows(src_ref, rows_in, rows_out):
        # width-2, stride-2 max pool along rows, per batch block (floor => last odd row dropped)
        parts = []
        for b in range(B):
            ev = src_ref[pl.ds(b * rows_in, rows_out, stride=POOL), :]
            od = src_ref[pl.ds(b * rows_in + 1, rows_out, stride=POOL), :]
            parts.append(jnp.maximum(ev, od))
        return jnp.concatenate(parts, axis=0)          # (B*rows_out, C)

    def conv_branch(xcol, w1, b1, w2f, b2, w3f, b3, wo, bo):
        # ---- conv1 + leaky, maxpool1, batch_norm ----
        a1 = _leaky(jnp.dot(xcol, w1, preferred_element_type=jnp.float32) + b1)   # (B*L1, H1)
        s1_ref[...] = a1                                                           # one full store
        h1 = _bn_rows(maxpool_rows(s1_ref, L1, P1))                                # (B*P1, H1)

        # ---- conv2 via single im2col matmul + leaky, maxpool2, batch_norm ----
        taps = []
        for k in range(K2):
            taps.append(jnp.concatenate(
                [h1[b * P1 + k: b * P1 + k + L2, :] for b in range(B)], axis=0))   # (B*L2, H1)
        x2 = jnp.concatenate(taps, axis=1)                                         # (B*L2, K2*H1)
        a2 = _leaky(jnp.dot(x2, w2f, preferred_element_type=jnp.float32) + b2)     # (B*L2, H2)
        s2_ref[...] = a2
        h2 = _bn_rows(maxpool_rows(s2_ref, L2, P2))                                # (B*P2, H2)

        # ---- conv3 (output length 1) via single im2col matmul + leaky, batch_norm ----
        x3 = jnp.concatenate(
            [jnp.concatenate([h2[b * P2 + k: b * P2 + k + 1, :] for k in range(K1)], axis=1)
             for b in range(B)], axis=0)                                           # (B, K1*H2)
        a3 = _leaky(jnp.dot(x3, w3f, preferred_element_type=jnp.float32) + b3)     # (B, H1)
        h3 = _bn_rows(a3)                                                          # flatten == identity

        # ---- ConvBlock output Linear(H1 -> CB_OUT) ----
        return jnp.dot(h3, wo, preferred_element_type=jnp.float32) + bo            # (B, CB_OUT)

    prot_out = conv_branch(xp_ref[...], pw1_ref[...], pb1_ref[...], pw2_ref[...], pb2_ref[...],
                           pw3_ref[...], pb3_ref[...], pwo_ref[...], pbo_ref[...])
    rna_out = conv_branch(xr_ref[...], rw1_ref[...], rb1_ref[...], rw2_ref[...], rb2_ref[...],
                          rw3_ref[...], rb3_ref[...], rwo_ref[...], rbo_ref[...])

    # ---- head: concat -> DenseWrapper -> DenseWrapper -> softmax ----
    cat = jnp.concatenate([prot_out, rna_out], axis=1)                             # (B, 2*CB_OUT)
    h = _bn_rows(_leaky(jnp.dot(cat, wd_ref[...],
                                preferred_element_type=jnp.float32) + bd_ref[...]))
    # TODO(synk): F.dropout(p=0.2) is stochastic; treated as identity (inference).
    o = _bn_rows(_leaky(jnp.dot(h, wh_ref[...],
                                preferred_element_type=jnp.float32) + bh_ref[...]))

    m = jnp.max(o, axis=1, keepdims=True)
    e = jnp.exp(o - m)
    denom = jnp.sum(e, axis=1, keepdims=True)
    out_ref[...] = e * pl.reciprocal(denom, approx=True)                           # EUP recip


# --------------------------------- wrapper ------------------------------------
def _im2col_conv1(x_ncl):
    """(B, 1, L) -> (B*L1, K1); xcol[b*L1+l, k] = x[b, 0, l+k].  One fused XLA op."""
    x = x_ncl[:, 0, :]
    cols = jnp.stack([x[:, k:k + L1] for k in range(K1)], axis=-1)   # (B, L1, K1)
    return cols.reshape(B * L1, K1)


def conjoint_cnn_forward(protein, rna, params):
    xp = _im2col_conv1(protein)
    xr = _im2col_conv1(rna)
    flat_args = (xp, xr) + tuple(params["prot"]) + tuple(params["rna"]) + tuple(params["head"])
    vmem = pl.BlockSpec(memory_space=pltpu.MemorySpace.VMEM)
    return pl.pallas_call(
        fused_kernel,
        out_shape=jax.ShapeDtypeStruct((B, 2), jnp.float32),
        in_specs=[vmem] * len(flat_args),
        out_specs=vmem,
        scratch_shapes=[
            pltpu.VMEM((B * L1, H1), jnp.float32),   # conv1 activation staging (pool1)
            pltpu.VMEM((B * L2, H2), jnp.float32),   # conv2 activation staging (pool2)
        ],
    )(*flat_args)


# ----------------------------- deterministic init ------------------------------
def init_params(key):
    keys = iter(jax.random.split(key, 24))

    def rnd(shape, scale=0.1):
        return scale * jax.random.normal(next(keys), shape, dtype=jnp.float32)

    def conv_block_params():
        # NOTE: conv weights use a custom (K, Cin, Cout) layout, pre-flattened to
        # (K*Cin, Cout) so every conv is one im2col matmul.  Importing real PyTorch
        # weights ((Cout, Cin, K)) would require a transpose.
        return (
            rnd((K1, H1)),                              # conv1 weight (Cin = 1)
            rnd((1, H1)),                               # conv1 bias
            rnd((K2, H1, H2)).reshape(K2 * H1, H2),     # conv2 weight (flattened)
            rnd((1, H2)),                               # conv2 bias
            rnd((K1, H2, H1)).reshape(K1 * H2, H1),     # conv3 weight (flattened)
            rnd((1, H1)),                               # conv3 bias
            rnd((H1, CB_OUT)),                          # ConvBlock output Linear weight
            rnd((1, CB_OUT)),                           # ConvBlock output Linear bias
        )

    prot = conv_block_params()
    rna = conv_block_params()
    headp = (
        rnd((2 * CB_OUT, HIDDEN_DENSE)),   # dense Linear weight
        rnd((1, HIDDEN_DENSE)),            # dense Linear bias
        rnd((HIDDEN_DENSE, 2)),            # output Linear weight
        rnd((1, 2)),                       # output Linear bias
    )
    return {"prot": prot, "rna": rna, "head": headp}


if __name__ == "__main__":
    key = jax.random.PRNGKey(0)
    kp, kprot, krna = jax.random.split(key, 3)
    params = init_params(kp)

    # PyTorch NCL conv inputs: (batch, channels=1, length)
    protein = jax.random.normal(kprot, (B, 1, L), dtype=jnp.float32)
    rna = jax.random.normal(krna, (B, 1, L), dtype=jnp.float32)

    out = jax.jit(conjoint_cnn_forward)(protein, rna, params)
    out = jax.block_until_ready(out)

    assert out.shape == (B, 2)
    assert bool(jnp.all(jnp.isfinite(out)))
    # softmax rows sum to 1 (approx reciprocal on the EUP -> loose tolerance)
    assert bool(jnp.allclose(jnp.sum(out, axis=1), 1.0, atol=5e-3))
    print("KERNEL_OK")
</pallas_src>

<mosaic_0001>
module attributes {stable_mosaic.version = 11 : i64} {
  func.func @fused_kernel(%arg0: memref<70x6xf32, #tpu.memory_space<vmem>>, %arg1: memref<70x6xf32, #tpu.memory_space<vmem>>, %arg2: memref<6x45xf32, #tpu.memory_space<vmem>>, %arg3: memref<1x45xf32, #tpu.memory_space<vmem>>, %arg4: memref<225x65xf32, #tpu.memory_space<vmem>>, %arg5: memref<1x65xf32, #tpu.memory_space<vmem>>, %arg6: memref<390x45xf32, #tpu.memory_space<vmem>>, %arg7: memref<1x45xf32, #tpu.memory_space<vmem>>, %arg8: memref<45x2xf32, #tpu.memory_space<vmem>>, %arg9: memref<1x2xf32, #tpu.memory_space<vmem>>, %arg10: memref<6x45xf32, #tpu.memory_space<vmem>>, %arg11: memref<1x45xf32, #tpu.memory_space<vmem>>, %arg12: memref<225x65xf32, #tpu.memory_space<vmem>>, %arg13: memref<1x65xf32, #tpu.memory_space<vmem>>, %arg14: memref<390x45xf32, #tpu.memory_space<vmem>>, %arg15: memref<1x45xf32, #tpu.memory_space<vmem>>, %arg16: memref<45x2xf32, #tpu.memory_space<vmem>>, %arg17: memref<1x2xf32, #tpu.memory_space<vmem>>, %arg18: memref<4x64xf32, #tpu.memory_space<vmem>>, %arg19: memref<1x64xf32, #tpu.memory_space<vmem>>, %arg20: memref<64x2xf32, #tpu.memory_space<vmem>>, %arg21: memref<1x2xf32, #tpu.memory_space<vmem>>, %arg22: memref<2x2xf32, #tpu.memory_space<vmem>>, %arg23: memref<70x45xf32, #tpu.memory_space<vmem>>, %arg24: memref<26x65xf32, #tpu.memory_space<vmem>>) attributes {dimension_semantics = [], scalar_prefetch = 0 : i64, scratch_operands = 2 : i64, tpu.core_type = #tpu.core_type<tc>} {
    %c0 = arith.constant 0 : index
    %c0_0 = arith.constant 0 : index
    %0 = vector.load %arg0[%c0, %c0_0] : memref<70x6xf32, #tpu.memory_space<vmem>>, vector<70x6xf32>
    %c0_1 = arith.constant 0 : index
    %c0_2 = arith.constant 0 : index
    %1 = vector.load %arg2[%c0_1, %c0_2] : memref<6x45xf32, #tpu.memory_space<vmem>>, vector<6x45xf32>
    %c0_3 = arith.constant 0 : index
    %c0_4 = arith.constant 0 : index
    %2 = vector.load %arg3[%c0_3, %c0_4] : memref<1x45xf32, #tpu.memory_space<vmem>>, vector<1x45xf32>
    %c0_5 = arith.constant 0 : index
    %c0_6 = arith.constant 0 : index
    %3 = vector.load %arg4[%c0_5, %c0_6] : memref<225x65xf32, #tpu.memory_space<vmem>>, vector<225x65xf32>
    %c0_7 = arith.constant 0 : index
    %c0_8 = arith.constant 0 : index
    %4 = vector.load %arg5[%c0_7, %c0_8] : memref<1x65xf32, #tpu.memory_space<vmem>>, vector<1x65xf32>
    %c0_9 = arith.constant 0 : index
    %c0_10 = arith.constant 0 : index
    %5 = vector.load %arg6[%c0_9, %c0_10] : memref<390x45xf32, #tpu.memory_space<vmem>>, vector<390x45xf32>
    %c0_11 = arith.constant 0 : index
    %c0_12 = arith.constant 0 : index
    %6 = vector.load %arg7[%c0_11, %c0_12] : memref<1x45xf32, #tpu.memory_space<vmem>>, vector<1x45xf32>
    %c0_13 = arith.constant 0 : index
    %c0_14 = arith.constant 0 : index
    %7 = vector.load %arg8[%c0_13, %c0_14] : memref<45x2xf32, #tpu.memory_space<vmem>>, vector<45x2xf32>
    %c0_15 = arith.constant 0 : index
    %c0_16 = arith.constant 0 : index
    %8 = vector.load %arg9[%c0_15, %c0_16] : memref<1x2xf32, #tpu.memory_space<vmem>>, vector<1x2xf32>
    %cst = arith.constant dense<0.000000e+00> : vector<70x45xf32>
    %9 = tpu.matmul %0, %1, %cst {dimension_numbers = #tpu.dot_dimension_numbers<[1], [0], [0], [1], [0, 0, 1, 1], [], []>} : vector<70x6xf32>, vector<6x45xf32>, vector<70x45xf32> -> vector<70x45xf32>
    %10 = vector.broadcast %2 : vector<1x45xf32> to vector<70x45xf32>
    %11 = arith.addf %9, %10 : vector<70x45xf32>
    %cst_17 = arith.constant 0.000000e+00 : f32
    %12 = vector.broadcast %cst_17 : f32 to vector<70x45xf32>
    %13 = arith.cmpf ogt, %11, %12 : vector<70x45xf32>
    %cst_18 = arith.constant 0.00999999977 : f32
    %14 = vector.broadcast %cst_18 : f32 to vector<70x45xf32>
    %15 = arith.mulf %14, %11 : vector<70x45xf32>
    %16 = arith.select %13, %11, %15 : vector<70x45xi1>, vector<70x45xf32>
    %c0_19 = arith.constant 0 : index
    %c0_20 = arith.constant 0 : index
    %17 = vector.load %arg23[%c0_19, %c0_20] : memref<70x45xf32, #tpu.memory_space<vmem>>, vector<70x45xf32>
    tpu.vector_store %arg23[%c0_19, %c0_20], %16 {strides = array<i32>} : memref<70x45xf32, #tpu.memory_space<vmem>>, vector<70x45xf32>,
    %c0_21 = arith.constant 0 : index
    %c0_22 = arith.constant 0 : index
    %18 = tpu.strided_load %arg23[%c0_21, %c0_22] {strides = array<i32: 2, 1>} : memref<70x45xf32, #tpu.memory_space<vmem>>, vector<17x45xf32>
    %c1 = arith.constant 1 : index
    %c0_23 = arith.constant 0 : index
    %19 = tpu.strided_load %arg23[%c1, %c0_23] {strides = array<i32: 2, 1>} : memref<70x45xf32, #tpu.memory_space<vmem>>, vector<17x45xf32>
    %20 = arith.maximumf %18, %19 : vector<17x45xf32>
    %c35 = arith.constant 35 : index
    %c0_24 = arith.constant 0 : index
    %21 = tpu.strided_load %arg23[%c35, %c0_24] {strides = array<i32: 2, 1>} : memref<70x45xf32, #tpu.memory_space<vmem>>, vector<17x45xf32>
    %c36 = arith.constant 36 : index
    %c0_25 = arith.constant 0 : index
    %22 = tpu.strided_load %arg23[%c36, %c0_25] {strides = array<i32: 2, 1>} : memref<70x45xf32, #tpu.memory_space<vmem>>, vector<17x45xf32>
    %23 = arith.maximumf %21, %22 : vector<17x45xf32>
    %24 = tpu.concatenate %20, %23 in 0 : vector<17x45xf32>, vector<17x45xf32> -> vector<34x45xf32>
    %cst_26 = arith.constant dense<0.000000e+00> : vector<45xf32>
    %25 = vector.multi_reduction <add>, %24, %cst_26 [0] : vector<34x45xf32> to vector<45xf32>
    %26 = vector.shape_cast %25 : vector<45xf32> to vector<1x45xf32>
    %cst_27 = arith.constant 3.400000e+01 : f32
    %27 = vector.broadcast %cst_27 : f32 to vector<1x45xf32>
    %28 = arith.divf %26, %27 : vector<1x45xf32>
    %29 = vector.broadcast %28 : vector<1x45xf32> to vector<34x45xf32>
    %30 = arith.subf %24, %29 : vector<34x45xf32>
    %31 = arith.mulf %30, %30 : vector<34x45xf32>
    %cst_28 = arith.constant dense<0.000000e+00> : vector<45xf32>
    %32 = vector.multi_reduction <add>, %31, %cst_28 [0] : vector<34x45xf32> to vector<45xf32>
    %33 = vector.shape_cast %32 : vector<45xf32> to vector<1x45xf32>
    %cst_29 = arith.constant 3.400000e+01 : f32
    %34 = vector.broadcast %cst_29 : f32 to vector<1x45xf32>
    %35 = arith.divf %33, %34 : vector<1x45xf32>
    %cst_30 = arith.constant 9.99999974E-6 : f32
    %36 = vector.broadcast %cst_30 : f32 to vector<1x45xf32>
    %37 = arith.addf %35, %36 : vector<1x45xf32>
    %38 = math.rsqrt %37 : vector<1x45xf32>
    %39 = vector.broadcast %38 : vector<1x45xf32> to vector<34x45xf32>
    %40 = arith.mulf %30, %39 : vector<34x45xf32>
    %41 = vector.extract_strided_slice %40 {offsets = [0, 0], sizes = [13, 45], strides = [1, 1]} : vector<34x45xf32> to vector<13x45xf32>
    %42 = vector.extract_strided_slice %40 {offsets = [17, 0], sizes = [13, 45], strides = [1, 1]} : vector<34x45xf32> to vector<13x45xf32>
    %43 = tpu.concatenate %41, %42 in 0 : vector<13x45xf32>, vector<13x45xf32> -> vector<26x45xf32>
    %44 = vector.extract_strided_slice %40 {offsets = [1, 0], sizes = [13, 45], strides = [1, 1]} : vector<34x45xf32> to vector<13x45xf32>
    %45 = vector.extract_strided_slice %40 {offsets = [18, 0], sizes = [13, 45], strides = [1, 1]} : vector<34x45xf32> to vector<13x45xf32>
    %46 = tpu.concatenate %44, %45 in 0 : vector<13x45xf32>, vector<13x45xf32> -> vector<26x45xf32>
    %47 = vector.extract_strided_slice %40 {offsets = [2, 0], sizes = [13, 45], strides = [1, 1]} : vector<34x45xf32> to vector<13x45xf32>
    %48 = vector.extract_strided_slice %40 {offsets = [19, 0], sizes = [13, 45], strides = [1, 1]} : vector<34x45xf32> to vector<13x45xf32>
    %49 = tpu.concatenate %47, %48 in 0 : vector<13x45xf32>, vector<13x45xf32> -> vector<26x45xf32>
    %50 = vector.extract_strided_slice %40 {offsets = [3, 0], sizes = [13, 45], strides = [1, 1]} : vector<34x45xf32> to vector<13x45xf32>
    %51 = vector.extract_strided_slice %40 {offsets = [20, 0], sizes = [13, 45], strides = [1, 1]} : vector<34x45xf32> to vector<13x45xf32>
    %52 = tpu.concatenate %50, %51 in 0 : vector<13x45xf32>, vector<13x45xf32> -> vector<26x45xf32>
    %53 = vector.extract_strided_slice %40 {offsets = [4, 0], sizes = [13, 45], strides = [1, 1]} : vector<34x45xf32> to vector<13x45xf32>
    %54 = vector.extract_strided_slice %40 {offsets = [21, 0], sizes = [13, 45], strides = [1, 1]} : vector<34x45xf32> to vector<13x45xf32>
    %55 = tpu.concatenate %53, %54 in 0 : vector<13x45xf32>, vector<13x45xf32> -> vector<26x45xf32>
    %56 = tpu.concatenate %43, %46, %49, %52, %55 in 1 : vector<26x45xf32>, vector<26x45xf32>, vector<26x45xf32>, vector<26x45xf32>, vector<26x45xf32> -> vector<26x225xf32>
    %cst_31 = arith.constant dense<0.000000e+00> : vector<26x65xf32>
    %57 = tpu.matmul %56, %3, %cst_31 {dimension_numbers = #tpu.dot_dimension_numbers<[1], [0], [0], [1], [0, 0, 1, 1], [], []>} : vector<26x225xf32>, vector<225x65xf32>, vector<26x65xf32> -> vector<26x65xf32>
    %58 = vector.broadcast %4 : vector<1x65xf32> to vector<26x65xf32>
    %59 = arith.addf %57, %58 : vector<26x65xf32>
    %cst_32 = arith.constant 0.000000e+00 : f32
    %60 = vector.broadcast %cst_32 : f32 to vector<26x65xf32>
    %61 = arith.cmpf ogt, %59, %60 : vector<26x65xf32>
    %cst_33 = arith.constant 0.00999999977 : f32
    %62 = vector.broadcast %cst_33 : f32 to vector<26x65xf32>
    %63 = arith.mulf %62, %59 : vector<26x65xf32>
    %64 = arith.select %61, %59, %63 : vector<26x65xi1>, vector<26x65xf32>
    %c0_34 = arith.constant 0 : index
    %c0_35 = arith.constant 0 : index
    %65 = vector.load %arg24[%c0_34, %c0_35] : memref<26x65xf32, #tpu.memory_space<vmem>>, vector<26x65xf32>
    tpu.vector_store %arg24[%c0_34, %c0_35], %64 {strides = array<i32>} : memref<26x65xf32, #tpu.memory_space<vmem>>, vector<26x65xf32>,
    %c0_36 = arith.constant 0 : index
    %c0_37 = arith.constant 0 : index
    %66 = tpu.strided_load %arg24[%c0_36, %c0_37] {strides = array<i32: 2, 1>} : memref<26x65xf32, #tpu.memory_space<vmem>>, vector<6x65xf32>
    %c1_38 = arith.constant 1 : index
    %c0_39 = arith.constant 0 : index
    %67 = tpu.strided_load %arg24[%c1_38, %c0_39] {strides = array<i32: 2, 1>} : memref<26x65xf32, #tpu.memory_space<vmem>>, vector<6x65xf32>
    %68 = arith.maximumf %66, %67 : vector<6x65xf32>
    %c13 = arith.constant 13 : index
    %c0_40 = arith.constant 0 : index
    %69 = tpu.strided_load %arg24[%c13, %c0_40] {strides = array<i32: 2, 1>} : memref<26x65xf32, #tpu.memory_space<vmem>>, vector<6x65xf32>
    %c14 = arith.constant 14 : index
    %c0_41 = arith.constant 0 : index
    %70 = tpu.strided_load %arg24[%c14, %c0_41] {strides = array<i32: 2, 1>} : memref<26x65xf32, #tpu.memory_space<vmem>>, vector<6x65xf32>
    %71 = arith.maximumf %69, %70 : vector<6x65xf32>
    %72 = tpu.concatenate %68, %71 in 0 : vector<6x65xf32>, vector<6x65xf32> -> vector<12x65xf32>
    %cst_42 = arith.constant dense<0.000000e+00> : vector<65xf32>
    %73 = vector.multi_reduction <add>, %72, %cst_42 [0] : vector<12x65xf32> to vector<65xf32>
    %74 = vector.shape_cast %73 : vector<65xf32> to vector<1x65xf32>
    %cst_43 = arith.constant 1.200000e+01 : f32
    %75 = vector.broadcast %cst_43 : f32 to vector<1x65xf32>
    %76 = arith.divf %74, %75 : vector<1x65xf32>
    %77 = vector.broadcast %76 : vector<1x65xf32> to vector<12x65xf32>
    %78 = arith.subf %72, %77 : vector<12x65xf32>
    %79 = arith.mulf %78, %78 : vector<12x65xf32>
    %cst_44 = arith.constant dense<0.000000e+00> : vector<65xf32>
    %80 = vector.multi_reduction <add>, %79, %cst_44 [0] : vector<12x65xf32> to vector<65xf32>
    %81 = vector.shape_cast %80 : vector<65xf32> to vector<1x65xf32>
    %cst_45 = arith.constant 1.200000e+01 : f32
    %82 = vector.broadcast %cst_45 : f32 to vector<1x65xf32>
    %83 = arith.divf %81, %82 : vector<1x65xf32>
    %cst_46 = arith.constant 9.99999974E-6 : f32
    %84 = vector.broadcast %cst_46 : f32 to vector<1x65xf32>
    %85 = arith.addf %83, %84 : vector<1x65xf32>
    %86 = math.rsqrt %85 : vector<1x65xf32>
    %87 = vector.broadcast %86 : vector<1x65xf32> to vector<12x65xf32>
    %88 = arith.mulf %78, %87 : vector<12x65xf32>
    %89 = vector.extract_strided_slice %88 {offsets = [0, 0], sizes = [1, 65], strides = [1, 1]} : vector<12x65xf32> to vector<1x65xf32>
    %90 = vector.extract_strided_slice %88 {offsets = [1, 0], sizes = [1, 65], strides = [1, 1]} : vector<12x65xf32> to vector<1x65xf32>
    %91 = vector.extract_strided_slice %88 {offsets = [2, 0], sizes = [1, 65], strides = [1, 1]} : vector<12x65xf32> to vector<1x65xf32>
    %92 = vector.extract_strided_slice %88 {offsets = [3, 0], sizes = [1, 65], strides = [1, 1]} : vector<12x65xf32> to vector<1x65xf32>
    %93 = vector.extract_strided_slice %88 {offsets = [4, 0], sizes = [1, 65], strides = [1, 1]} : vector<12x65xf32> to vector<1x65xf32>
    %94 = vector.extract_strided_slice %88 {offsets = [5, 0], sizes = [1, 65], strides = [1, 1]} : vector<12x65xf32> to vector<1x65xf32>
    %95 = tpu.concatenate %89, %90, %91, %92, %93, %94 in 1 : vector<1x65xf32>, vector<1x65xf32>, vector<1x65xf32>, vector<1x65xf32>, vector<1x65xf32>, vector<1x65xf32> -> vector<1x390xf32>
    %96 = vector.extract_strided_slice %88 {offsets = [6, 0], sizes = [1, 65], strides = [1, 1]} : vector<12x65xf32> to vector<1x65xf32>
    %97 = vector.extract_strided_slice %88 {offsets = [7, 0], sizes = [1, 65], strides = [1, 1]} : vector<12x65xf32> to vector<1x65xf32>
    %98 = vector.extract_strided_slice %88 {offsets = [8, 0], sizes = [1, 65], strides = [1, 1]} : vector<12x65xf32> to vector<1x65xf32>
    %99 = vector.extract_strided_slice %88 {offsets = [9, 0], sizes = [1, 65], strides = [1, 1]} : vector<12x65xf32> to vector<1x65xf32>
    %100 = vector.extract_strided_slice %88 {offsets = [10, 0], sizes = [1, 65], strides = [1, 1]} : vector<12x65xf32> to vector<1x65xf32>
    %101 = vector.extract_strided_slice %88 {offsets = [11, 0], sizes = [1, 65], strides = [1, 1]} : vector<12x65xf32> to vector<1x65xf32>
    %102 = tpu.concatenate %96, %97, %98, %99, %100, %101 in 1 : vector<1x65xf32>, vector<1x65xf32>, vector<1x65xf32>, vector<1x65xf32>, vector<1x65xf32>, vector<1x65xf32> -> vector<1x390xf32>
    %103 = tpu.concatenate %95, %102 in 0 : vector<1x390xf32>, vector<1x390xf32> -> vector<2x390xf32>
    %cst_47 = arith.constant dense<0.000000e+00> : vector<2x45xf32>
    %104 = tpu.matmul %103, %5, %cst_47 {dimension_numbers = #tpu.dot_dimension_numbers<[1], [0], [0], [1], [0, 0, 1, 1], [], []>} : vector<2x390xf32>, vector<390x45xf32>, vector<2x45xf32> -> vector<2x45xf32>
    %105 = vector.broadcast %6 : vector<1x45xf32> to vector<2x45xf32>
    %106 = arith.addf %104, %105 : vector<2x45xf32>
    %cst_48 = arith.constant 0.000000e+00 : f32
    %107 = vector.broadcast %cst_48 : f32 to vector<2x45xf32>
    %108 = arith.cmpf ogt, %106, %107 : vector<2x45xf32>
    %cst_49 = arith.constant 0.00999999977 : f32
    %109 = vector.broadcast %cst_49 : f32 to vector<2x45xf32>
    %110 = arith.mulf %109, %106 : vector<2x45xf32>
    %111 = arith.select %108, %106, %110 : vector<2x45xi1>, vector<2x45xf32>
    %cst_50 = arith.constant dense<0.000000e+00> : vector<45xf32>
    %112 = vector.multi_reduction <add>, %111, %cst_50 [0] : vector<2x45xf32> to vector<45xf32>
    %113 = vector.shape_cast %112 : vector<45xf32> to vector<1x45xf32>
    %cst_51 = arith.constant 2.000000e+00 : f32
    %114 = vector.broadcast %cst_51 : f32 to vector<1x45xf32>
    %115 = arith.divf %113, %114 : vector<1x45xf32>
    %116 = vector.broadcast %115 : vector<1x45xf32> to vector<2x45xf32>
    %117 = arith.subf %111, %116 : vector<2x45xf32>
    %118 = arith.mulf %117, %117 : vector<2x45xf32>
    %cst_52 = arith.constant dense<0.000000e+00> : vector<45xf32>
    %119 = vector.multi_reduction <add>, %118, %cst_52 [0] : vector<2x45xf32> to vector<45xf32>
    %120 = vector.shape_cast %119 : vector<45xf32> to vector<1x45xf32>
    %cst_53 = arith.constant 2.000000e+00 : f32
    %121 = vector.broadcast %cst_53 : f32 to vector<1x45xf32>
    %122 = arith.divf %120, %121 : vector<1x45xf32>
    %cst_54 = arith.constant 9.99999974E-6 : f32
    %123 = vector.broadcast %cst_54 : f32 to vector<1x45xf32>
    %124 = arith.addf %122, %123 : vector<1x45xf32>
    %125 = math.rsqrt %124 : vector<1x45xf32>
    %126 = vector.broadcast %125 : vector<1x45xf32> to vector<2x45xf32>
    %127 = arith.mulf %117, %126 : vector<2x45xf32>
    %cst_55 = arith.constant dense<0.000000e+00> : vector<2x2xf32>
    %128 = tpu.matmul %127, %7, %cst_55 {dimension_numbers = #tpu.dot_dimension_numbers<[1], [0], [0], [1], [0, 0, 1, 1], [], []>} : vector<2x45xf32>, vector<45x2xf32>, vector<2x2xf32> -> vector<2x2xf32>
    %129 = vector.broadcast %8 : vector<1x2xf32> to vector<2x2xf32>
    %130 = arith.addf %128, %129 : vector<2x2xf32>
    %c0_56 = arith.constant 0 : index
    %c0_57 = arith.constant 0 : index
    %131 = vector.load %arg1[%c0_56, %c0_57] : memref<70x6xf32, #tpu.memory_space<vmem>>, vector<70x6xf32>
    %c0_58 = arith.constant 0 : index
    %c0_59 = arith.constant 0 : index
    %132 = vector.load %arg10[%c0_58, %c0_59] : memref<6x45xf32, #tpu.memory_space<vmem>>, vector<6x45xf32>
    %c0_60 = arith.constant 0 : index
    %c0_61 = arith.constant 0 : index
    %133 = vector.load %arg11[%c0_60, %c0_61] : memref<1x45xf32, #tpu.memory_space<vmem>>, vector<1x45xf32>
    %c0_62 = arith.constant 0 : index
    %c0_63 = arith.constant 0 : index
    %134 = vector.load %arg12[%c0_62, %c0_63] : memref<225x65xf32, #tpu.memory_space<vmem>>, vector<225x65xf32>
    %c0_64 = arith.constant 0 : index
    %c0_65 = arith.constant 0 : index
    %135 = vector.load %arg13[%c0_64, %c0_65] : memref<1x65xf32, #tpu.memory_space<vmem>>, vector<1x65xf32>
    %c0_66 = arith.constant 0 : index
    %c0_67 = arith.constant 0 : index
    %136 = vector.load %arg14[%c0_66, %c0_67] : memref<390x45xf32, #tpu.memory_space<vmem>>, vector<390x45xf32>
    %c0_68 = arith.constant 0 : index
    %c0_69 = arith.constant 0 : index
    %137 = vector.load %arg15[%c0_68, %c0_69] : memref<1x45xf32, #tpu.memory_space<vmem>>, vector<1x45xf32>
    %c0_70 = arith.constant 0 : index
    %c0_71 = arith.constant 0 : index
    %138 = vector.load %arg16[%c0_70, %c0_71] : memref<45x2xf32, #tpu.memory_space<vmem>>, vector<45x2xf32>
    %c0_72 = arith.constant 0 : index
    %c0_73 = arith.constant 0 : index
    %139 = vector.load %arg17[%c0_72, %c0_73] : memref<1x2xf32, #tpu.memory_space<vmem>>, vector<1x2xf32>
    %cst_74 = arith.constant dense<0.000000e+00> : vector<70x45xf32>
    %140 = tpu.matmul %131, %132, %cst_74 {dimension_numbers = #tpu.dot_dimension_numbers<[1], [0], [0], [1], [0, 0, 1, 1], [], []>} : vector<70x6xf32>, vector<6x45xf32>, vector<70x45xf32> -> vector<70x45xf32>
    %141 = vector.broadcast %133 : vector<1x45xf32> to vector<70x45xf32>
    %142 = arith.addf %140, %141 : vector<70x45xf32>
    %cst_75 = arith.constant 0.000000e+00 : f32
    %143 = vector.broadcast %cst_75 : f32 to vector<70x45xf32>
    %144 = arith.cmpf ogt, %142, %143 : vector<70x45xf32>
    %cst_76 = arith.constant 0.00999999977 : f32
    %145 = vector.broadcast %cst_76 : f32 to vector<70x45xf32>
    %146 = arith.mulf %145, %142 : vector<70x45xf32>
    %147 = arith.select %144, %142, %146 : vector<70x45xi1>, vector<70x45xf32>
    %c0_77 = arith.constant 0 : index
    %c0_78 = arith.constant 0 : index
    %148 = vector.load %arg23[%c0_77, %c0_78] : memref<70x45xf32, #tpu.memory_space<vmem>>, vector<70x45xf32>
    tpu.vector_store %arg23[%c0_77, %c0_78], %147 {strides = array<i32>} : memref<70x45xf32, #tpu.memory_space<vmem>>, vector<70x45xf32>,
    %c0_79 = arith.constant 0 : index
    %c0_80 = arith.constant 0 : index
    %149 = tpu.strided_load %arg23[%c0_79, %c0_80] {strides = array<i32: 2, 1>} : memref<70x45xf32, #tpu.memory_space<vmem>>, vector<17x45xf32>
    %c1_81 = arith.constant 1 : index
    %c0_82 = arith.constant 0 : index
    %150 = tpu.strided_load %arg23[%c1_81, %c0_82] {strides = array<i32: 2, 1>} : memref<70x45xf32, #tpu.memory_space<vmem>>, vector<17x45xf32>
    %151 = arith.maximumf %149, %150 : vector<17x45xf32>
    %c35_83 = arith.constant 35 : index
    %c0_84 = arith.constant 0 : index
    %152 = tpu.strided_load %arg23[%c35_83, %c0_84] {strides = array<i32: 2, 1>} : memref<70x45xf32, #tpu.memory_space<vmem>>, vector<17x45xf32>
    %c36_85 = arith.constant 36 : index
    %c0_86 = arith.constant 0 : index
    %153 = tpu.strided_load %arg23[%c36_85, %c0_86] {strides = array<i32: 2, 1>} : memref<70x45xf32, #tpu.memory_space<vmem>>, vector<17x45xf32>
    %154 = arith.maximumf %152, %153 : vector<17x45xf32>
    %155 = tpu.concatenate %151, %154 in 0 : vector<17x45xf32>, vector<17x45xf32> -> vector<34x45xf32>
    %cst_87 = arith.constant dense<0.000000e+00> : vector<45xf32>
    %156 = vector.multi_reduction <add>, %155, %cst_87 [0] : vector<34x45xf32> to vector<45xf32>
    %157 = vector.shape_cast %156 : vector<45xf32> to vector<1x45xf32>
    %cst_88 = arith.constant 3.400000e+01 : f32
    %158 = vector.broadcast %cst_88 : f32 to vector<1x45xf32>
    %159 = arith.divf %157, %158 : vector<1x45xf32>
    %160 = vector.broadcast %159 : vector<1x45xf32> to vector<34x45xf32>
    %161 = arith.subf %155, %160 : vector<34x45xf32>
    %162 = arith.mulf %161, %161 : vector<34x45xf32>
    %cst_89 = arith.constant dense<0.000000e+00> : vector<45xf32>
    %163 = vector.multi_reduction <add>, %162, %cst_89 [0] : vector<34x45xf32> to vector<45xf32>
    %164 = vector.shape_cast %163 : vector<45xf32> to vector<1x45xf32>
    %cst_90 = arith.constant 3.400000e+01 : f32
    %165 = vector.broadcast %cst_90 : f32 to vector<1x45xf32>
    %166 = arith.divf %164, %165 : vector<1x45xf32>
    %cst_91 = arith.constant 9.99999974E-6 : f32
    %167 = vector.broadcast %cst_91 : f32 to vector<1x45xf32>
    %168 = arith.addf %166, %167 : vector<1x45xf32>
    %169 = math.rsqrt %168 : vector<1x45xf32>
    %170 = vector.broadcast %169 : vector<1x45xf32> to vector<34x45xf32>
    %171 = arith.mulf %161, %170 : vector<34x45xf32>
    %172 = vector.extract_strided_slice %171 {offsets = [0, 0], sizes = [13, 45], strides = [1, 1]} : vector<34x45xf32> to vector<13x45xf32>
    %173 = vector.extract_strided_slice %171 {offsets = [17, 0], sizes = [13, 45], strides = [1, 1]} : vector<34x45xf32> to vector<13x45xf32>
    %174 = tpu.concatenate %172, %173 in 0 : vector<13x45xf32>, vector<13x45xf32> -> vector<26x45xf32>
    %175 = vector.extract_strided_slice %171 {offsets = [1, 0], sizes = [13, 45], strides = [1, 1]} : vector<34x45xf32> to vector<13x45xf32>
    %176 = vector.extract_strided_slice %171 {offsets = [18, 0], sizes = [13, 45], strides = [1, 1]} : vector<34x45xf32> to vector<13x45xf32>
    %177 = tpu.concatenate %175, %176 in 0 : vector<13x45xf32>, vector<13x45xf32> -> vector<26x45xf32>
    %178 = vector.extract_strided_slice %171 {offsets = [2, 0], sizes = [13, 45], strides = [1, 1]} : vector<34x45xf32> to vector<13x45xf32>
    %179 = vector.extract_strided_slice %171 {offsets = [19, 0], sizes = [13, 45], strides = [1, 1]} : vector<34x45xf32> to vector<13x45xf32>
    %180 = tpu.concatenate %178, %179 in 0 : vector<13x45xf32>, vector<13x45xf32> -> vector<26x45xf32>
    %181 = vector.extract_strided_slice %171 {offsets = [3, 0], sizes = [13, 45], strides = [1, 1]} : vector<34x45xf32> to vector<13x45xf32>
    %182 = vector.extract_strided_slice %171 {offsets = [20, 0], sizes = [13, 45], strides = [1, 1]} : vector<34x45xf32> to vector<13x45xf32>
    %183 = tpu.concatenate %181, %182 in 0 : vector<13x45xf32>, vector<13x45xf32> -> vector<26x45xf32>
    %184 = vector.extract_strided_slice %171 {offsets = [4, 0], sizes = [13, 45], strides = [1, 1]} : vector<34x45xf32> to vector<13x45xf32>
    %185 = vector.extract_strided_slice %171 {offsets = [21, 0], sizes = [13, 45], strides = [1, 1]} : vector<34x45xf32> to vector<13x45xf32>
    %186 = tpu.concatenate %184, %185 in 0 : vector<13x45xf32>, vector<13x45xf32> -> vector<26x45xf32>
    %187 = tpu.concatenate %174, %177, %180, %183, %186 in 1 : vector<26x45xf32>, vector<26x45xf32>, vector<26x45xf32>, vector<26x45xf32>, vector<26x45xf32> -> vector<26x225xf32>
    %cst_92 = arith.constant dense<0.000000e+00> : vector<26x65xf32>
    %188 = tpu.matmul %187, %134, %cst_92 {dimension_numbers = #tpu.dot_dimension_numbers<[1], [0], [0], [1], [0, 0, 1, 1], [], []>} : vector<26x225xf32>, vector<225x65xf32>, vector<26x65xf32> -> vector<26x65xf32>
    %189 = vector.broadcast %135 : vector<1x65xf32> to vector<26x65xf32>
    %190 = arith.addf %188, %189 : vector<26x65xf32>
    %cst_93 = arith.constant 0.000000e+00 : f32
    %191 = vector.broadcast %cst_93 : f32 to vector<26x65xf32>
    %192 = arith.cmpf ogt, %190, %191 : vector<26x65xf32>
    %cst_94 = arith.constant 0.00999999977 : f32
    %193 = vector.broadcast %cst_94 : f32 to vector<26x65xf32>
    %194 = arith.mulf %193, %190 : vector<26x65xf32>
    %195 = arith.select %192, %190, %194 : vector<26x65xi1>, vector<26x65xf32>
    %c0_95 = arith.constant 0 : index
    %c0_96 = arith.constant 0 : index
    %196 = vector.load %arg24[%c0_95, %c0_96] : memref<26x65xf32, #tpu.memory_space<vmem>>, vector<26x65xf32>
    tpu.vector_store %arg24[%c0_95, %c0_96], %195 {strides = array<i32>} : memref<26x65xf32, #tpu.memory_space<vmem>>, vector<26x65xf32>,
    %c0_97 = arith.constant 0 : index
    %c0_98 = arith.constant 0 : index
    %197 = tpu.strided_load %arg24[%c0_97, %c0_98] {strides = array<i32: 2, 1>} : memref<26x65xf32, #tpu.memory_space<vmem>>, vector<6x65xf32>
    %c1_99 = arith.constant 1 : index
    %c0_100 = arith.constant 0 : index
    %198 = tpu.strided_load %arg24[%c1_99, %c0_100] {strides = array<i32: 2, 1>} : memref<26x65xf32, #tpu.memory_space<vmem>>, vector<6x65xf32>
    %199 = arith.maximumf %197, %198 : vector<6x65xf32>
    %c13_101 = arith.constant 13 : index
    %c0_102 = arith.constant 0 : index
    %200 = tpu.strided_load %arg24[%c13_101, %c0_102] {strides = array<i32: 2, 1>} : memref<26x65xf32, #tpu.memory_space<vmem>>, vector<6x65xf32>
    %c14_103 = arith.constant 14 : index
    %c0_104 = arith.constant 0 : index
    %201 = tpu.strided_load %arg24[%c14_103, %c0_104] {strides = array<i32: 2, 1>} : memref<26x65xf32, #tpu.memory_space<vmem>>, vector<6x65xf32>
    %202 = arith.maximumf %200, %201 : vector<6x65xf32>
    %203 = tpu.concatenate %199, %202 in 0 : vector<6x65xf32>, vector<6x65xf32> -> vector<12x65xf32>
    %cst_105 = arith.constant dense<0.000000e+00> : vector<65xf32>
    %204 = vector.multi_reduction <add>, %203, %cst_105 [0] : vector<12x65xf32> to vector<65xf32>
    %205 = vector.shape_cast %204 : vector<65xf32> to vector<1x65xf32>
    %cst_106 = arith.constant 1.200000e+01 : f32
    %206 = vector.broadcast %cst_106 : f32 to vector<1x65xf32>
    %207 = arith.divf %205, %206 : vector<1x65xf32>
    %208 = vector.broadcast %207 : vector<1x65xf32> to vector<12x65xf32>
    %209 = arith.subf %203, %208 : vector<12x65xf32>
    %210 = arith.mulf %209, %209 : vector<12x65xf32>
    %cst_107 = arith.constant dense<0.000000e+00> : vector<65xf32>
    %211 = vector.multi_reduction <add>, %210, %cst_107 [0] : vector<12x65xf32> to vector<65xf32>
    %212 = vector.shape_cast %211 : vector<65xf32> to vector<1x65xf32>
    %cst_108 = arith.constant 1.200000e+01 : f32
    %213 = vector.broadcast %cst_108 : f32 to vector<1x65xf32>
    %214 = arith.divf %212, %213 : vector<1x65xf32>
    %cst_109 = arith.constant 9.99999974E-6 : f32
    %215 = vector.broadcast %cst_109 : f32 to vector<1x65xf32>
    %216 = arith.addf %214, %215 : vector<1x65xf32>
    %217 = math.rsqrt %216 : vector<1x65xf32>
    %218 = vector.broadcast %217 : vector<1x65xf32> to vector<12x65xf32>
    %219 = arith.mulf %209, %218 : vector<12x65xf32>
    %220 = vector.extract_strided_slice %219 {offsets = [0, 0], sizes = [1, 65], strides = [1, 1]} : vector<12x65xf32> to vector<1x65xf32>
    %221 = vector.extract_strided_slice %219 {offsets = [1, 0], sizes = [1, 65], strides = [1, 1]} : vector<12x65xf32> to vector<1x65xf32>
    %222 = vector.extract_strided_slice %219 {offsets = [2, 0], sizes = [1, 65], strides = [1, 1]} : vector<12x65xf32> to vector<1x65xf32>
    %223 = vector.extract_strided_slice %219 {offsets = [3, 0], sizes = [1, 65], strides = [1, 1]} : vector<12x65xf32> to vector<1x65xf32>
    %224 = vector.extract_strided_slice %219 {offsets = [4, 0], sizes = [1, 65], strides = [1, 1]} : vector<12x65xf32> to vector<1x65xf32>
    %225 = vector.extract_strided_slice %219 {offsets = [5, 0], sizes = [1, 65], strides = [1, 1]} : vector<12x65xf32> to vector<1x65xf32>
    %226 = tpu.concatenate %220, %221, %222, %223, %224, %225 in 1 : vector<1x65xf32>, vector<1x65xf32>, vector<1x65xf32>, vector<1x65xf32>, vector<1x65xf32>, vector<1x65xf32> -> vector<1x390xf32>
    %227 = vector.extract_strided_slice %219 {offsets = [6, 0], sizes = [1, 65], strides = [1, 1]} : vector<12x65xf32> to vector<1x65xf32>
    %228 = vector.extract_strided_slice %219 {offsets = [7, 0], sizes = [1, 65], strides = [1, 1]} : vector<12x65xf32> to vector<1x65xf32>
    %229 = vector.extract_strided_slice %219 {offsets = [8, 0], sizes = [1, 65], strides = [1, 1]} : vector<12x65xf32> to vector<1x65xf32>
    %230 = vector.extract_strided_slice %219 {offsets = [9, 0], sizes = [1, 65], strides = [1, 1]} : vector<12x65xf32> to vector<1x65xf32>
    %231 = vector.extract_strided_slice %219 {offsets = [10, 0], sizes = [1, 65], strides = [1, 1]} : vector<12x65xf32> to vector<1x65xf32>
    %232 = vector.extract_strided_slice %219 {offsets = [11, 0], sizes = [1, 65], strides = [1, 1]} : vector<12x65xf32> to vector<1x65xf32>
    %233 = tpu.concatenate %227, %228, %229, %230, %231, %232 in 1 : vector<1x65xf32>, vector<1x65xf32>, vector<1x65xf32>, vector<1x65xf32>, vector<1x65xf32>, vector<1x65xf32> -> vector<1x390xf32>
    %234 = tpu.concatenate %226, %233 in 0 : vector<1x390xf32>, vector<1x390xf32> -> vector<2x390xf32>
    %cst_110 = arith.constant dense<0.000000e+00> : vector<2x45xf32>
    %235 = tpu.matmul %234, %136, %cst_110 {dimension_numbers = #tpu.dot_dimension_numbers<[1], [0], [0], [1], [0, 0, 1, 1], [], []>} : vector<2x390xf32>, vector<390x45xf32>, vector<2x45xf32> -> vector<2x45xf32>
    %236 = vector.broadcast %137 : vector<1x45xf32> to vector<2x45xf32>
    %237 = arith.addf %235, %236 : vector<2x45xf32>
    %cst_111 = arith.constant 0.000000e+00 : f32
    %238 = vector.broadcast %cst_111 : f32 to vector<2x45xf32>
    %239 = arith.cmpf ogt, %237, %238 : vector<2x45xf32>
    %cst_112 = arith.constant 0.00999999977 : f32
    %240 = vector.broadcast %cst_112 : f32 to vector<2x45xf32>
    %241 = arith.mulf %240, %237 : vector<2x45xf32>
    %242 = arith.select %239, %237, %241 : vector<2x45xi1>, vector<2x45xf32>
    %cst_113 = arith.constant dense<0.000000e+00> : vector<45xf32>
    %243 = vector.multi_reduction <add>, %242, %cst_113 [0] : vector<2x45xf32> to vector<45xf32>
    %244 = vector.shape_cast %243 : vector<45xf32> to vector<1x45xf32>
    %cst_114 = arith.constant 2.000000e+00 : f32
    %245 = vector.broadcast %cst_114 : f32 to vector<1x45xf32>
    %246 = arith.divf %244, %245 : vector<1x45xf32>
    %247 = vector.broadcast %246 : vector<1x45xf32> to vector<2x45xf32>
    %248 = arith.subf %242, %247 : vector<2x45xf32>
    %249 = arith.mulf %248, %248 : vector<2x45xf32>
    %cst_115 = arith.constant dense<0.000000e+00> : vector<45xf32>
    %250 = vector.multi_reduction <add>, %249, %cst_115 [0] : vector<2x45xf32> to vector<45xf32>
    %251 = vector.shape_cast %250 : vector<45xf32> to vector<1x45xf32>
    %cst_116 = arith.constant 2.000000e+00 : f32
    %252 = vector.broadcast %cst_116 : f32 to vector<1x45xf32>
    %253 = arith.divf %251, %252 : vector<1x45xf32>
    %cst_117 = arith.constant 9.99999974E-6 : f32
    %254 = vector.broadcast %cst_117 : f32 to vector<1x45xf32>
    %255 = arith.addf %253, %254 : vector<1x45xf32>
    %256 = math.rsqrt %255 : vector<1x45xf32>
    %257 = vector.broadcast %256 : vector<1x45xf32> to vector<2x45xf32>
    %258 = arith.mulf %248, %257 : vector<2x45xf32>
    %cst_118 = arith.constant dense<0.000000e+00> : vector<2x2xf32>
    %259 = tpu.matmul %258, %138, %cst_118 {dimension_numbers = #tpu.dot_dimension_numbers<[1], [0], [0], [1], [0, 0, 1, 1], [], []>} : vector<2x45xf32>, vector<45x2xf32>, vector<2x2xf32> -> vector<2x2xf32>
    %260 = vector.broadcast %139 : vector<1x2xf32> to vector<2x2xf32>
    %261 = arith.addf %259, %260 : vector<2x2xf32>
    %262 = tpu.concatenate %130, %261 in 1 : vector<2x2xf32>, vector<2x2xf32> -> vector<2x4xf32>
    %c0_119 = arith.constant 0 : index
    %c0_120 = arith.constant 0 : index
    %263 = vector.load %arg18[%c0_119, %c0_120] : memref<4x64xf32, #tpu.memory_space<vmem>>, vector<4x64xf32>
    %cst_121 = arith.constant dense<0.000000e+00> : vector<2x64xf32>
    %264 = tpu.matmul %262, %263, %cst_121 {dimension_numbers = #tpu.dot_dimension_numbers<[1], [0], [0], [1], [0, 0, 1, 1], [], []>} : vector<2x4xf32>, vector<4x64xf32>, vector<2x64xf32> -> vector<2x64xf32>
    %c0_122 = arith.constant 0 : index
    %c0_123 = arith.constant 0 : index
    %265 = vector.load %arg19[%c0_122, %c0_123] : memref<1x64xf32, #tpu.memory_space<vmem>>, vector<1x64xf32>
    %266 = vector.broadcast %265 : vector<1x64xf32> to vector<2x64xf32>
    %267 = arith.addf %264, %266 : vector<2x64xf32>
    %cst_124 = arith.constant 0.000000e+00 : f32
    %268 = vector.broadcast %cst_124 : f32 to vector<2x64xf32>
    %269 = arith.cmpf ogt, %267, %268 : vector<2x64xf32>
    %cst_125 = arith.constant 0.00999999977 : f32
    %270 = vector.broadcast %cst_125 : f32 to vector<2x64xf32>
    %271 = arith.mulf %270, %267 : vector<2x64xf32>
    %272 = arith.select %269, %267, %271 : vector<2x64xi1>, vector<2x64xf32>
    %cst_126 = arith.constant dense<0.000000e+00> : vector<64xf32>
    %273 = vector.multi_reduction <add>, %272, %cst_126 [0] : vector<2x64xf32> to vector<64xf32>
    %274 = vector.shape_cast %273 : vector<64xf32> to vector<1x64xf32>
    %cst_127 = arith.constant 2.000000e+00 : f32
    %275 = vector.broadcast %cst_127 : f32 to vector<1x64xf32>
    %276 = arith.divf %274, %275 : vector<1x64xf32>
    %277 = vector.broadcast %276 : vector<1x64xf32> to vector<2x64xf32>
    %278 = arith.subf %272, %277 : vector<2x64xf32>
    %279 = arith.mulf %278, %278 : vector<2x64xf32>
    %cst_128 = arith.constant dense<0.000000e+00> : vector<64xf32>
    %280 = vector.multi_reduction <add>, %279, %cst_128 [0] : vector<2x64xf32> to vector<64xf32>
    %281 = vector.shape_cast %280 : vector<64xf32> to vector<1x64xf32>
    %cst_129 = arith.constant 2.000000e+00 : f32
    %282 = vector.broadcast %cst_129 : f32 to vector<1x64xf32>
    %283 = arith.divf %281, %282 : vector<1x64xf32>
    %cst_130 = arith.constant 9.99999974E-6 : f32
    %284 = vector.broadcast %cst_130 : f32 to vector<1x64xf32>
    %285 = arith.addf %283, %284 : vector<1x64xf32>
    %286 = math.rsqrt %285 : vector<1x64xf32>
    %287 = vector.broadcast %286 : vector<1x64xf32> to vector<2x64xf32>
    %288 = arith.mulf %278, %287 : vector<2x64xf32>
    %c0_131 = arith.constant 0 : index
    %c0_132 = arith.constant 0 : index
    %289 = vector.load %arg20[%c0_131, %c0_132] : memref<64x2xf32, #tpu.memory_space<vmem>>, vector<64x2xf32>
    %cst_133 = arith.constant dense<0.000000e+00> : vector<2x2xf32>
    %290 = tpu.matmul %288, %289, %cst_133 {dimension_numbers = #tpu.dot_dimension_numbers<[1], [0], [0], [1], [0, 0, 1, 1], [], []>} : vector<2x64xf32>, vector<64x2xf32>, vector<2x2xf32> -> vector<2x2xf32>
    %c0_134 = arith.constant 0 : index
    %c0_135 = arith.constant 0 : index
    %291 = vector.load %arg21[%c0_134, %c0_135] : memref<1x2xf32, #tpu.memory_space<vmem>>, vector<1x2xf32>
    %292 = vector.broadcast %291 : vector<1x2xf32> to vector<2x2xf32>
    %293 = arith.addf %290, %292 : vector<2x2xf32>
    %cst_136 = arith.constant 0.000000e+00 : f32
    %294 = vector.broadcast %cst_136 : f32 to vector<2x2xf32>
    %295 = arith.cmpf ogt, %293, %294 : vector<2x2xf32>
    %cst_137 = arith.constant 0.00999999977 : f32
    %296 = vector.broadcast %cst_137 : f32 to vector<2x2xf32>
    %297 = arith.mulf %296, %293 : vector<2x2xf32>
    %298 = arith.select %295, %293, %297 : vector<2x2xi1>, vector<2x2xf32>
    %cst_138 = arith.constant dense<0.000000e+00> : vector<2xf32>
    %299 = vector.multi_reduction <add>, %298, %cst_138 [0] : vector<2x2xf32> to vector<2xf32>
    %300 = vector.shape_cast %299 : vector<2xf32> to vector<1x2xf32>
    %cst_139 = arith.constant 2.000000e+00 : f32
    %301 = vector.broadcast %cst_139 : f32 to vector<1x2xf32>
    %302 = arith.divf %300, %301 : vector<1x2xf32>
    %303 = vector.broadcast %302 : vector<1x2xf32> to vector<2x2xf32>
    %304 = arith.subf %298, %303 : vector<2x2xf32>
    %305 = arith.mulf %304, %304 : vector<2x2xf32>
    %cst_140 = arith.constant dense<0.000000e+00> : vector<2xf32>
    %306 = vector.multi_reduction <add>, %305, %cst_140 [0] : vector<2x2xf32> to vector<2xf32>
    %307 = vector.shape_cast %306 : vector<2xf32> to vector<1x2xf32>
    %cst_141 = arith.constant 2.000000e+00 : f32
    %308 = vector.broadcast %cst_141 : f32 to vector<1x2xf32>
    %309 = arith.divf %307, %308 : vector<1x2xf32>
    %cst_142 = arith.constant 9.99999974E-6 : f32
    %310 = vector.broadcast %cst_142 : f32 to vector<1x2xf32>
    %311 = arith.addf %309, %310 : vector<1x2xf32>
    %312 = math.rsqrt %311 : vector<1x2xf32>
    %313 = vector.broadcast %312 : vector<1x2xf32> to vector<2x2xf32>
    %314 = arith.mulf %304, %313 : vector<2x2xf32>
    %cst_143 = arith.constant dense<0xFF800000> : vector<2xf32>
    %315 = vector.multi_reduction <maximumf>, %314, %cst_143 [1] : vector<2x2xf32> to vector<2xf32>
    %316 = vector.shape_cast %315 : vector<2xf32> to vector<2x1xf32>
    %317 = vector.broadcast %316 : vector<2x1xf32> to vector<2x2xf32>
    %318 = arith.subf %314, %317 : vector<2x2xf32>
    %319 = math.exp %318 : vector<2x2xf32>
    %cst_144 = arith.constant dense<0.000000e+00> : vector<2xf32>
    %320 = vector.multi_reduction <add>, %319, %cst_144 [1] : vector<2x2xf32> to vector<2xf32>
    %321 = vector.shape_cast %320 : vector<2xf32> to vector<2x1xf32>
    %322 = tpu.reciprocal %321 {approx = true} : vector<2x1xf32> -> vector<2x1xf32>
    %323 = vector.broadcast %322 : vector<2x1xf32> to vector<2x2xf32>
    %324 = arith.mulf %319, %323 : vector<2x2xf32>
    %c0_145 = arith.constant 0 : index
    %c0_146 = arith.constant 0 : index
    %325 = vector.load %arg22[%c0_145, %c0_146] : memref<2x2xf32, #tpu.memory_space<vmem>>, vector<2x2xf32>
    tpu.vector_store %arg22[%c0_145, %c0_146], %324 {strides = array<i32>} : memref<2x2xf32, #tpu.memory_space<vmem>>, vector<2x2xf32>,
    return
  }
}

</mosaic_0001>

<bundles_post_ra>
// kernel: conjoint_cnn_forward.1
= control target key start
LH: loop header
LB: loop body
LE: loop exit
PB: predicated region body
PF: predicated region fallthrough
CT: control target
= control target key end

     0   :  { %s3865_s0 = inlined_call_operand.vmem [shape: f32[70,6], index: 0, kind: input, shape index: {}]   ;;  %s3866_s1 = inlined_call_operand.vmem [shape: f32[70,6], index: 1, kind: input, shape index: {}]   ;;  %s3867_s2 = inlined_call_operand.vmem [shape: f32[6,45], index: 2, kind: input, shape index: {}]   ;;  %s3868_s3 = inlined_call_operand.vmem [shape: f32[1,45], index: 3, kind: input, shape index: {}]   ;;  %s3869_s4 = inlined_call_operand.vmem [shape: f32[225,65], index: 4, kind: input, shape index: {}]   ;;  %s3870_s5 = inlined_call_operand.vmem [shape: f32[1,65], index: 5, kind: input, shape index: {}]   ;;  %s3871_s6 = inlined_call_operand.vmem [shape: f32[390,45], index: 6, kind: input, shape index: {}]   ;;  %s3872_s7 = inlined_call_operand.vmem [shape: f32[1,45], index: 7, kind: input, shape index: {}]   ;;  %s3873_s8 = inlined_call_operand.vmem [shape: f32[45,2], index: 8, kind: input, shape index: {}]   ;;  %s3874_s9 = inlined_call_operand.vmem [shape: f32[1,2], index: 9, kind: input, shape index: {}]   ;;  %s3875_s10 = inlined_call_operand.vmem [shape: f32[6,45], index: 10, kind: input, shape index: {}]   ;;  %s3876_s11 = inlined_call_operand.vmem [shape: f32[1,45], index: 11, kind: input, shape index: {}]   ;;  %s3877_s12 = inlined_call_operand.vmem [shape: f32[225,65], index: 12, kind: input, shape index: {}]   ;;  %s3878_s13 = inlined_call_operand.vmem [shape: f32[1,65], index: 13, kind: input, shape index: {}]   ;;  %s3879_s14 = inlined_call_operand.vmem [shape: f32[390,45], index: 14, kind: input, shape index: {}]   ;;  %s3880_s15 = inlined_call_operand.vmem [shape: f32[1,45], index: 15, kind: input, shape index: {}]   ;;  %s3881_s16 = inlined_call_operand.vmem [shape: f32[45,2], index: 16, kind: input, shape index: {}]   ;;  %s3882_s17 = inlined_call_operand.vmem [shape: f32[1,2], index: 17, kind: input, shape index: {}]   ;;  %s3883_s18 = inlined_call_operand.vmem [shape: f32[4,64], index: 18, kind: input, shape index: {}]   ;;  %s3884_s19 = inlined_call_operand.vmem [shape: f32[1,64], index: 19, kind: input, shape index: {}]   ;;  %s3885_s20 = inlined_call_operand.vmem [shape: f32[64,2], index: 20, kind: input, shape index: {}]   ;;  %s3886_s21 = inlined_call_operand.vmem [shape: f32[1,2], index: 21, kind: input, shape index: {}]   ;;  %s3887_s22 = inlined_call_operand.hbm [shape: f32[2,2], index: 22, kind: output, shape index: {}]  }
   0x1   :  { %3907 = sst [smem:[#allocation7_spill]] %s3865_s0 }
   0x2   :  { %3908 = sst [smem:[#allocation8_spill]] %s3866_s1 }
   0x3   :  { %3909 = sst [smem:[#allocation9_spill]] %s3867_s2 }
   0x4   :  { %3910 = sst [smem:[#allocation10_spill]] %s3868_s3 }
   0x5   :  { %3911 = sst [smem:[#allocation11_spill]] %s3869_s4 }
   0x6   :  { %3912 = sst [smem:[#allocation12_spill]] %s3870_s5 }
   0x7   :  { %3913 = sst [smem:[#allocation13_spill]] %s3871_s6 }
   0x8   :  { %s3914_s29 = sld [smem:[#allocation9_spill]]  ;;  %vm204_vm0 = vcmask 1045504   ;;  %v2635_v2 = vmov 0.0   ;;  %vm2636_vm1 = vmmov 0   ;;  %vm3905_vm2 = vcmask 48128  }
   0x9   :  { %s3915_s0 = sld [smem:[#allocation7_spill]]  ;;  %2439 = vmatprep.subr.mxu1 %v2635_v2  ;;  %2441 = vmatprep.mubr.msk.f32.mxu1 %vm2636_vm1, %v2635_v2 }
   0xe   :  { %v81_v0 = vld [vmem:[%s3914_s29] sm:$0x3f] }
   0xf   :  { %v72_v1 = vld [vmem:[%s3915_s0] sm:$0xff]  ;;  %2440 = vmatpush3.msk.msra.mxu1 %vm204_vm0, %v81_v0  ;;  %v73_v3 = vld [vmem:[%s3915_s0 + $0x8] sm:$0xff] }
  0x10   :  { %2442 = vmatmul.mubr.msk.f32.vlgmr.msra.gmra.mxu1 %vm3905_vm2, %v72_v1  ;;  %594 = vmatprep.subr.mxu1 %v2635_v2 }
  0x11   :  { %2444 = vmatprep.mubr.msk.f32.mxu1 %vm2636_vm1, %v2635_v2 }
  0x12   :  { %27 = vsyncpa [#allocation5], 0  ;;  %v74_v4 = vld [vmem:[%s3915_s0 + $0x10] sm:$0xff]  ;;  %v75_v5 = vld [vmem:[%s3915_s0 + $0x18] sm:$0xff]  ;;  %s3916_s6 = sld [smem:[#allocation10_spill]]  ;;  %vm345_vm4 = vcmask 367616  }
  0x13   :  { %v76_v6 = vld [vmem:[%s3915_s0 + $0x20] sm:$0xff]  ;;  %v77_v7 = vld [vmem:[%s3915_s0 + $0x28] sm:$0xff]  ;;  %v78_v8 = vld [vmem:[%s3915_s0 + $0x30] sm:$0xff]  ;;  %s3917_s26 = sld [smem:[#allocation11_spill]]  ;;  %vm354_vm13 = vcmask 365568   ;;  %vm388_vm14 = vcmask 1040384  }
  0x14   :  { %2445 = vmatmul.mubr.msk.f32.gmra.mxu1 %vm3905_vm2, %v73_v3  ;;  %v79_v9 = vld [vmem:[%s3915_s0 + $0x38] sm:$0xff]  ;;  %v80_v10 = vld [vmem:[%s3915_s0 + $0x40] sm:$0x3f]  ;;  %vm405_vm15 = vcmask 361472   ;;  %s2637_s2 = smov 52   ;;  %s3892_s27 = smov 45  }
  0x15   :  { %2447 = vmatprep.mubr.msk.f32.mxu1 %vm2636_vm1, %v2635_v2  ;;  %s2640_s3 = smov 7   ;;  %s3918_s30 = sld [smem:[#allocation13_spill]] }
  0x16   :  { %s2641_s1 = smov 65   ;;  %s2642_s5 = smov 2  }
  0x17   :  { %s2643_s24 = smov 67   ;;  %s3920_s0 = sld [smem:[#allocation8_spill]] }
  0x18   :  { %2448 = vmatmul.mubr.msk.f32.gmra.mxu1 %vm3905_vm2, %v74_v4  ;;  %v2825_v11 = vld [vmem:[%s3916_s6] ss:$0 sm:$0xff]  ;;  %s2644_s6 = smov 4  }
  0x19   :  { %2450 = vmatprep.mubr.msk.f32.mxu1 %vm2636_vm1, %v2635_v2  ;;  %v98_v32 = vld [vmem:[%s3917_s26 + $0x78] sm:$0xff]  ;;  %v97_v33 = vld [vmem:[%s3917_s26 + $0x70] sm:$0xff]  ;;  %v96_v37 = vld [vmem:[%s3917_s26 + $0x68] sm:$0xff] }
  0x1a   :  { %595 = vmatpush1.msra.mxu1 %v98_v32  ;;  %v95_v40 = vld [vmem:[%s3917_s26 + $0x60] sm:$0xff]  ;;  %v94_v44 = vld [vmem:[%s3917_s26 + $0x58] sm:$0xff]  ;;  %v93_v47 = vld [vmem:[%s3917_s26 + $0x50] sm:$0xff] }
  0x1b   :  { %596 = vmatprep.subr.mxu1 %v2635_v2  ;;  %v92_v51 = vld [vmem:[%s3917_s26 + $0x48] sm:$0xff]  ;;  %v91_v54 = vld [vmem:[%s3917_s26 + $0x40] sm:$0xff]  ;;  %v90_v58 = vld [vmem:[%s3917_s26 + $0x38] sm:$0xff] }
  0x1c   :  { %2451 = vmatmul.mubr.msk.f32.gmra.mxu1 %vm3905_vm2, %v75_v5  ;;  %v89_v61 = vld [vmem:[%s3917_s26 + $0x30] sm:$0xff]  ;;  %v88_v1 = vld [vmem:[%s3917_s26 + $0x28] sm:$0xff]  ;;  %v87_v4 = vld [vmem:[%s3917_s26 + $0x20] sm:$0xff] }
  0x1d   :  { %2453 = vmatprep.mubr.msk.f32.mxu1 %vm2636_vm1, %v2635_v2  ;;  %597 = vmatpush1.msra.mxu1 %v97_v33 }
  0x1e   :  { %598 = vmatprep.subr.mxu1 %v2635_v2 }
  0x1f   :  { %599 = vmatpush1.msra.mxu1 %v96_v37 }
  0x20   :  { %2454 = vmatmul.mubr.msk.f32.gmra.mxu1 %vm3905_vm2, %v76_v6  ;;  %600 = vmatprep.subr.mxu1 %v2635_v2 }
  0x21   :  { %2456 = vmatprep.mubr.msk.f32.mxu1 %vm2636_vm1, %v2635_v2  ;;  %601 = vmatpush1.msra.mxu1 %v95_v40 }
  0x22   :  { %602 = vmatprep.subr.mxu1 %v2635_v2 }
  0x23   :  { %603 = vmatpush1.msra.mxu1 %v94_v44 }
  0x24   :  { %2457 = vmatmul.mubr.msk.f32.gmra.mxu1 %vm3905_vm2, %v77_v7  ;;  %604 = vmatprep.subr.mxu1 %v2635_v2 }
  0x25   :  { %2459 = vmatprep.mubr.msk.f32.mxu1 %vm2636_vm1, %v2635_v2  ;;  %605 = vmatpush1.msra.mxu1 %v93_v47 }
  0x26   :  { %606 = vmatprep.subr.mxu1 %v2635_v2 }
  0x27   :  { %607 = vmatpush1.msra.mxu1 %v92_v51 }
  0x28   :  { %2460 = vmatmul.mubr.msk.f32.gmra.mxu1 %vm3905_vm2, %v78_v8  ;;  %608 = vmatprep.subr.mxu1 %v2635_v2 }
  0x29   :  { %2462 = vmatprep.mubr.msk.f32.mxu1 %vm2636_vm1, %v2635_v2  ;;  %609 = vmatpush1.msra.mxu1 %v91_v54 }
  0x2a   :  { %610 = vmatprep.subr.mxu1 %v2635_v2 }
  0x2b   :  { %611 = vmatpush1.msra.mxu1 %v90_v58 }
  0x2c   :  { %2463 = vmatmul.mubr.msk.f32.gmra.mxu1 %vm3905_vm2, %v79_v9  ;;  %612 = vmatprep.subr.mxu1 %v2635_v2  ;;  %v86_v9 = vld [vmem:[%s3917_s26 + $0x18] sm:$0xff] }
  0x2d   :  { %2465 = vmatprep.mubr.msk.f32.mxu1 %vm2636_vm1, %v2635_v2  ;;  %613 = vmatpush1.msra.mxu1 %v89_v61 }
  0x2e   :  { %614 = vmatprep.subr.mxu1 %v2635_v2 }
  0x2f   :  { %615 = vmatpush1.msra.mxu1 %v88_v1 }
  0x30   :  { %2466 = vmatmul.mubr.msk.f32.gmra.mxu1 %vm3905_vm2, %v80_v10  ;;  %616 = vmatprep.subr.mxu1 %v2635_v2 }
  0x31   :  { %617 = vmatpush1.msra.mxu1 %v87_v4 }
  0x32   :  { %618 = vmatprep.subr.mxu1 %v2635_v2 }
  0x33   :  { %619 = vmatpush1.msra.mxu1 %v86_v9 }
  0x34   :  { %620 = vmatprep.subr.mxu1 %v2635_v2 }
  0xd0   :  { %v274_v12 = vpop.f32.mrf.mxu1 }
  0xd1   :  { %v275_v13 = vadd.f32 %v2825_v11, %v274_v12  ;;  %v85_v12 = vld [vmem:[%s3917_s26 + $0x10] sm:$0xff] }
  0xd2   :  { %v2443_v14 = vpop.f32.mrf.mxu1  ;;  %621 = vmatpush1.msra.mxu1 %v85_v12 }
  0xd3   :  { %vm318_vm3 = vcmp.gt.f32.partialorder %v275_v13, 0.0  ;;  %v327_v15 = vmul.f32 0.01, %v275_v13  ;;  %622 = vmatprep.subr.mxu1 %v2635_v2 }
  0xd4   :  { %v279_v16 = vpop.f32.mrf.mxu1 }
  0xd5   :  { %v336_v17 = vsel %vm318_vm3, %v275_v13, %v327_v15  ;;  %v280_v18 = vadd.f32 %v2825_v11, %v279_v16  ;;  %vm458_vm3 = vcmask 1044480  }
  0xd6   :  { %346 = vst.msk [vmem:[#allocation2] sm:$0xff] %vm345_vm4, %v336_v17  ;;  %v2446_v19 = vpop.f32.mrf.mxu1 }
  0xd7   :  { %vm319_vm5 = vcmp.gt.f32.partialorder %v280_v18, 0.0  ;;  %v328_v20 = vmul.f32 0.01, %v280_v18  ;;  %v84_v19 = vld [vmem:[%s3917_s26 + $0x8] sm:$0xff] }
  0xd8   :  { %v284_v21 = vpop.f32.mrf.mxu1  ;;  %623 = vmatpush1.msra.mxu1 %v84_v19 }
  0xd9   :  { %v337_v22 = vsel %vm319_vm5, %v280_v18, %v328_v20  ;;  %v285_v23 = vadd.f32 %v2825_v11, %v284_v21  ;;  %624 = vmatprep.subr.mxu1 %v2635_v2  ;;  %vm462_vm5 = vcmask 1046528  }
  0xda   :  { %347 = vst.msk [vmem:[#allocation2 + $0x8] sm:$0xff] %vm345_vm4, %v337_v22  ;;  %v2449_v24 = vpop.f32.mrf.mxu1  ;;  %v83_v22 = vld [vmem:[%s3917_s26] sm:$0xff] }
  0xdb   :  { %vm320_vm6 = vcmp.gt.f32.partialorder %v285_v23, 0.0  ;;  %v329_v25 = vmul.f32 0.01, %v285_v23  ;;  %625 = vmatpush1.msra.mxu1 %v83_v22  ;;  %v103_v22 = vld [vmem:[%s3917_s26 + $0xa0] sm:$0xff] }
  0xdc   :  { %v289_v26 = vpop.f32.mrf.mxu1  ;;  %632 = vmatprep.subr.mxu1 %v2635_v2 }
  0xdd   :  { %v338_v27 = vsel %vm320_vm6, %v285_v23, %v329_v25  ;;  %v290_v28 = vadd.f32 %v2825_v11, %v289_v26  ;;  %v111_v23 = vld [vmem:[%s3917_s26 + $0xe0] sm:$0x1]  ;;  %vm3906_vm6 = vcmask 1043456  }
  0xde   :  { %348 = vst.msk [vmem:[#allocation2 + $0x10] sm:$0xff] %vm345_vm4, %v338_v27  ;;  %v2452_v29 = vpop.f32.mrf.mxu1  ;;  %2285 = vmatpush2.msk.msra.mxu1 %vm388_vm14, %v111_v23  ;;  %v102_v23 = vld [vmem:[%s3917_s26 + $0x98] sm:$0xff] }
  0xdf   :  { %vm321_vm7 = vcmp.gt.f32.partialorder %v290_v28, 0.0  ;;  %v330_v30 = vmul.f32 0.01, %v290_v28  ;;  %634 = vmatprep.subr.mxu1 %v2635_v2 }
  0xe0   :  { %v294_v31 = vpop.f32.mrf.mxu1 }
  0xe1   :  { %v339_v34 = vsel %vm321_vm7, %v290_v28, %v330_v30  ;;  %v295_v35 = vadd.f32 %v2825_v11, %v294_v31  ;;  %v356_v15 = vld [vmem:[#allocation2] ss:$2 sm:$0xff]  ;;  %v362_v16 = vld [vmem:[#allocation2 + $0x1] ss:$2 sm:$0xff]  ;;  %vm477_vm7 = vcmask 1041408  }
  0xe2   :  { %349 = vst.msk [vmem:[#allocation2 + $0x18] sm:$0xff] %vm345_vm4, %v339_v34  ;;  %v2455_v36 = vpop.f32.mrf.mxu1  ;;  %v367_v21 = vmax.f32 %v356_v15, %v362_v16  ;;  %v110_v34 = vld [vmem:[%s3917_s26 + $0xd8] sm:$0xff] }
  0xe3   :  { %vm322_vm8 = vcmp.gt.f32.partialorder %v295_v35, 0.0  ;;  %v331_v38 = vmul.f32 0.01, %v295_v35  ;;  %635 = vmatpush2.msra.mxu1 %v110_v34 }
  0xe4   :  { %v299_v39 = vpop.f32.mrf.mxu1  ;;  %v398_v32 = vsel %vm345_vm4, %v367_v21, 0.0  ;;  %636 = vmatprep.subr.mxu1 %v2635_v2 }
  0xe5   :  { %v340_v41 = vsel %vm322_vm8, %v295_v35, %v331_v38  ;;  %v300_v42 = vadd.f32 %v2825_v11, %v299_v39  ;;  %v109_v38 = vld [vmem:[%s3917_s26 + $0xd0] sm:$0xff]  ;;  %vm3898_vm8 = vcmask 1042432  }
  0xe6   :  { %350 = vst.msk [vmem:[#allocation2 + $0x20] sm:$0xff] %vm345_vm4, %v340_v41  ;;  %v2458_v43 = vpop.f32.mrf.mxu1  ;;  %637 = vmatpush2.msra.mxu1 %v109_v38 }
  0xe7   :  { %vm323_vm9 = vcmp.gt.f32.partialorder %v300_v42, 0.0  ;;  %v332_v45 = vmul.f32 0.01, %v300_v42  ;;  %v108_v43 = vld [vmem:[%s3917_s26 + $0xc8] sm:$0xff]  ;;  %638 = vmatprep.subr.mxu1 %v2635_v2 }
  0xe8   :  { %v304_v46 = vpop.f32.mrf.mxu1  ;;  %639 = vmatpush2.msra.mxu1 %v108_v43 }
  0xe9   :  { %v341_v48 = vsel %vm323_vm9, %v300_v42, %v332_v45  ;;  %v305_v49 = vadd.f32 %v2825_v11, %v304_v46  ;;  %v358_v10 = vld [vmem:[#allocation2 + $0x10] ss:$2 sm:$0xff]  ;;  %v107_v46 = vld [vmem:[%s3917_s26 + $0xc0] sm:$0xff]  ;;  %640 = vmatprep.subr.mxu1 %v2635_v2  ;;  %vm3897_vm9 = vcmask 56320  }
  0xea   :  { %351 = vst.msk [vmem:[#allocation2 + $0x28] sm:$0xff] %vm345_vm4, %v341_v48  ;;  %v2461_v50 = vpop.f32.mrf.mxu1  ;;  %v106_v48 = vld [vmem:[%s3917_s26 + $0xb8] sm:$0xff]  ;;  %641 = vmatpush2.msra.mxu1 %v107_v46 }
  0xeb   :  { %vm324_vm10 = vcmp.gt.f32.partialorder %v305_v49, 0.0  ;;  %v333_v52 = vmul.f32 0.01, %v305_v49  ;;  %642 = vmatprep.subr.mxu1 %v2635_v2  ;;  %v105_v50 = vld [vmem:[%s3917_s26 + $0xb0] sm:$0xff] }
  0xec   :  { %v309_v53 = vpop.f32.mrf.mxu1  ;;  %643 = vmatpush2.msra.mxu1 %v106_v48 }
  0xed   :  { %v342_v55 = vsel %vm324_vm10, %v305_v49, %v333_v52  ;;  %v310_v56 = vadd.f32 %v2825_v11, %v309_v53  ;;  %v360_v13 = vld [vmem:[#allocation2 + $0x20] ss:$2 sm:$0x1]  ;;  %v366_v14 = vld [vmem:[#allocation2 + $0x21] ss:$2 sm:$0x1]  ;;  %644 = vmatprep.subr.mxu1 %v2635_v2 }
  0xee   :  { %352 = vst.msk [vmem:[#allocation2 + $0x30] sm:$0xff] %vm345_vm4, %v342_v55  ;;  %v2464_v57 = vpop.f32.mrf.mxu1  ;;  %v369_v20 = vmax.f32 %v360_v13, %v366_v14  ;;  %645 = vmatpush2.msra.mxu1 %v105_v50  ;;  %vm3896_vm10 = vcmask 424960  }
  0xef   :  { %vm325_vm11 = vcmp.gt.f32.partialorder %v310_v56, 0.0  ;;  %v334_v59 = vmul.f32 0.01, %v310_v56  ;;  %646 = vmatprep.subr.mxu1 %v2635_v2 }
  0xf0   :  { %v314_v60 = vpop.f32.mrf.mxu1 }
  0xf1   :  { %v343_v62 = vsel %vm325_vm11, %v310_v56, %v334_v59  ;;  %v315_v63 = vadd.f32 %v2825_v11, %v314_v60  ;;  %v364_v11 = vld [vmem:[#allocation2 + $0x11] ss:$2 sm:$0xff]  ;;  %vm3895_vm11 = vcmask 793600  }
  0xf2   :  { %353 = vst.msk [vmem:[#allocation2 + $0x38] sm:$0xff] %vm345_vm4, %v343_v62  ;;  %v2467_v0 = vpop.f32.mrf.mxu1  ;;  %v2899_v18 = vmax.f32 %v358_v10, %v364_v11 }
  0xf3   :  { %vm326_vm12 = vcmp.gt.f32.partialorder %v315_v63, 0.0  ;;  %v335_v3 = vmul.f32 0.01, %v315_v63 }
  0xf4   :  { %v399_v29 = vsel %vm345_vm4, %v2899_v18, 0.0 }
  0xf5   :  { %v344_v5 = vsel %vm326_vm12, %v315_v63, %v335_v3  ;;  %v371_v6 = vld [vmem:[#allocation2 + $0x23] ss:$2 sm:$0xff]  ;;  %v377_v7 = vld [vmem:[#allocation2 + $0x24] ss:$2 sm:$0xff]  ;;  %v400_v37 = vadd.f32 %v399_v29, %v398_v32  ;;  %vm3894_vm12 = vcmask 736256  }
  0xf6   :  { %355 = vst.msk [vmem:[#allocation2 + $0x40] sm:$0x3f] %vm354_vm13, %v344_v5  ;;  %v382_v8 = vmax.f32 %v371_v6, %v377_v7 }
  0xf8   :  { %v389_v17 = vrot.slane %v382_v8, 7 }
  0xfa   :  { %v397_v26 = vsel %vm388_vm14, %v369_v20, %v389_v17 }
  0xfb   :  { %v401_v33 = vsel %vm345_vm4, %v397_v26, 0.0 }
  0xfc   :  { %v402_v41 = vadd.f32 %v401_v33, %v400_v37 }
  0xfd   :  { %v373_v24 = vld [vmem:[#allocation2 + $0x33] ss:$2 sm:$0xff]  ;;  %v375_v25 = vld [vmem:[#allocation2 + $0x43] ss:$2 sm:$0x1] }
  0xfe   :  { %v379_v27 = vld [vmem:[#allocation2 + $0x34] ss:$2 sm:$0xff]  ;;  %v381_v28 = vld [vmem:[#allocation2 + $0x44] ss:$2 sm:$0x1] }
  0xff   :  { %v383_v30 = vmax.f32 %v373_v24, %v379_v27  ;;  %v384_v31 = vmax.f32 %v375_v25, %v381_v28  ;;  %v101_v24 = vld [vmem:[%s3917_s26 + $0x90] sm:$0xff]  ;;  %v100_v25 = vld [vmem:[%s3917_s26 + $0x88] sm:$0xff]  ;;  %v99_v27 = vld [vmem:[%s3917_s26 + $0x80] sm:$0xff] }
 0x101   :  { %v390_v35 = vrot.slane %v383_v30, 7  ;;  %v392_v36 = vrot.slane %v384_v31, 7 }
 0x103   :  { %v391_v39 = vsel %vm388_vm14, %v389_v17, %v390_v35  ;;  %v393_v40 = vsel %vm388_vm14, %v390_v35, %v392_v36 }
 0x104   :  { %v403_v42 = vsel %vm345_vm4, %v391_v39, 0.0  ;;  %v406_v45 = vsel %vm405_vm15, %v393_v40, 0.0 }
 0x105   :  { %v404_v44 = vadd.f32 %v403_v42, %v402_v41 }
 0x107   :  { %v407_v47 = vadd.f32 %v406_v45, %v404_v44 }
 0x109   :  { %v408_v49 = vrot.slane %v407_v47, 4 }
 0x10b   :  { %v409_v51 = vadd.f32 %v408_v49, %v407_v47 }
 0x10d   :  { %v410_v52 = vrot.slane %v409_v51, 2 }
 0x10f   :  { %v411_v53 = vadd.f32 %v410_v52, %v409_v51 }
 0x111   :  { %v412_v54 = vrot.slane %v411_v53, 1 }
 0x113   :  { %v413_v55 = vadd.f32 %v412_v54, %v411_v53 }
 0x115   :  { %v415_v56 = vmul.f32 0.029411765, %v413_v55 }
 0x117   :  { %v416_v57 = vsub.f32 %v367_v21, %v415_v56  ;;  %v417_v58 = vsub.f32 %v2899_v18, %v415_v56  ;;  %v418_v59 = vsub.f32 %v397_v26, %v415_v56  ;;  %v419_v60 = vsub.f32 %v391_v39, %v415_v56  ;;  %v104_v21 = vld [vmem:[%s3917_s26 + $0xa8] sm:$0xff]  ;;  %s2638_s26 = smov 90  }
 0x118   :  { %v2950_v61 = vsub.f32 %v393_v40, %v415_v56  ;;  %647 = vmatpush2.msra.mxu1 %v104_v21 }
 0x119   :  { %v421_v62 = vmul.f32 %v416_v57, %v416_v57  ;;  %v422_v63 = vmul.f32 %v417_v58, %v417_v58  ;;  %v423_v0 = vmul.f32 %v418_v59, %v418_v59  ;;  %v424_v1 = vmul.f32 %v419_v60, %v419_v60  ;;  %648 = vmatprep.subr.mxu1 %v2635_v2 }
 0x11a   :  { %v425_v6 = vmul.f32 %v2950_v61, %v2950_v61  ;;  %649 = vmatpush2.msra.mxu1 %v103_v22 }
 0x11b   :  { %v426_v3 = vsel %vm345_vm4, %v421_v62, 0.0  ;;  %v427_v4 = vsel %vm345_vm4, %v422_v63, 0.0  ;;  %v429_v7 = vsel %vm345_vm4, %v423_v0, 0.0  ;;  %v431_v9 = vsel %vm345_vm4, %v424_v1, 0.0  ;;  %650 = vmatprep.subr.mxu1 %v2635_v2 }
 0x11c   :  { %v428_v5 = vadd.f32 %v427_v4, %v426_v3  ;;  %v433_v11 = vsel %vm405_vm15, %v425_v6, 0.0  ;;  %651 = vmatpush2.msra.mxu1 %v102_v23 }
 0x11d   :  { %652 = vmatprep.subr.mxu1 %v2635_v2 }
 0x11e   :  { %v430_v8 = vadd.f32 %v429_v7, %v428_v5  ;;  %653 = vmatpush2.msra.mxu1 %v101_v24 }
 0x11f   :  { %654 = vmatprep.subr.mxu1 %v2635_v2 }
 0x120   :  { %v432_v10 = vadd.f32 %v431_v9, %v430_v8  ;;  %655 = vmatpush2.msra.mxu1 %v100_v25 }
 0x121   :  { %656 = vmatprep.subr.mxu1 %v2635_v2 }
 0x122   :  { %v434_v12 = vadd.f32 %v433_v11, %v432_v10  ;;  %657 = vmatpush2.msra.mxu1 %v99_v27 }
 0x123   :  { %1560 = vmatprep.subr.mxu1 %v2635_v2 }
 0x124   :  { %v435_v13 = vrot.slane %v434_v12, 4 }
 0x126   :  { %v436_v14 = vadd.f32 %v435_v13, %v434_v12 }
 0x128   :  { %v437_v15 = vrot.slane %v436_v14, 2 }
 0x12a   :  { %v438_v16 = vadd.f32 %v437_v15, %v436_v14 }
 0x12c   :  { %v439_v17 = vrot.slane %v438_v16, 1 }
 0x12e   :  { %v440_v18 = vadd.f32 %v439_v17, %v438_v16 }
 0x130   :  { %v441_v19 = vmul.f32 0.029411765, %v440_v18 }
 0x132   :  { %v442_v20 = vadd.f32 1e-05, %v441_v19 }
 0x134   :  { %2593 = vrsqrt.f32 %v442_v20 }
 0x141   :  { %v2594_v26 = vpop.eup %2593 }
 0x142   :  { %v2981_v28 = vmul.f32 %v2594_v26, %v419_v60  ;;  %v2983_v29 = vmul.f32 %v2594_v26, %v416_v57  ;;  %v445_v30 = vmul.f32 %v2594_v26, %v417_v58  ;;  %v446_v31 = vmul.f32 %v2594_v26, %v418_v59 }
 0x143   :  { %v448_v58 = vmul.f32 %v2594_v26, %v2950_v61 }
 0x144   :  { %545 = vrot.lane.b32.xlu0 %v2981_v28, %s2637_s2  ;;  %v479_v32 = vrot.slane %v2981_v28, 6  ;;  %v473_v33 = vrot.slane %v2983_v29, 2  ;;  %v474_v34 = vrot.slane %v445_v30, 2  ;;  %v463_v35 = vrot.slane %v2983_v29, 1 }
 0x145   :  { %v464_v36 = vrot.slane %v445_v30, 1  ;;  %v468_v37 = vrot.slane %v446_v31, 5  ;;  %v483_v41 = vrot.slane %v2983_v29, 3  ;;  %v484_v42 = vrot.slane %v445_v30, 3 }
 0x146   :  { %521 = vrot.lane.b32.xlu1 %v479_v32, %s2638_s26  ;;  %v475_v38 = vsel %vm204_vm0, %v473_v33, %v474_v34  ;;  %v495_v44 = vrot.slane %v2983_v29, 4  ;;  %v496_v45 = vrot.slane %v445_v30, 4  ;;  %v452_v46 = vrot.slane %v446_v31, 4 }
 0x147   :  { %v465_v39 = vsel %vm462_vm5, %v463_v35, %v464_v36  ;;  %v472_v40 = vsel %vm458_vm3, %v464_v36, %v468_v37  ;;  %v453_v47 = vrot.slane %v2981_v28, 4  ;;  %v485_v48 = vsel %vm458_vm3, %v483_v41, %v484_v42  ;;  %v126_v41 = vld [vmem:[%s3918_s30 + $0x68] sm:$0xff] }
 0x148   :  { %515 = vrot.lane.b32.xlu0 %v475_v38, %s2638_s26  ;;  %v2563_v43 = vpack.i.bf16 %v472_v40, %v465_v39  ;;  %v478_v49 = vrot.slane %v446_v31, 6  ;;  %v459_v50 = vsel %vm458_vm3, %v445_v30, %v452_v46  ;;  %v497_v52 = vsel %vm3906_vm6, %v495_v44, %v496_v45  ;;  %v143_v38 = vld [vmem:[%s3918_s30 + $0xf0] sm:$0xff]  ;;  %v142_v40 = vld [vmem:[%s3918_s30 + $0xe8] sm:$0xff]  ;;  %v140_v44 = vld [vmem:[%s3918_s30 + $0xd8] sm:$0xff] }
 0x149   :  { %v454_v51 = vsel %vm3906_vm6, %v452_v46, %v453_v47  ;;  %v488_v53 = vrot.slane %v446_v31, 7  ;;  %v489_v55 = vrot.slane %v2981_v28, 7  ;;  %v498_v59 = vsel %vm3906_vm6, %v496_v45, %v452_v46  ;;  %v127_v39 = vld [vmem:[%s3918_s30 + $0x70] sm:$0xff]  ;;  %v124_v45 = vld [vmem:[%s3918_s30 + $0x58] sm:$0xff] }
 0x14a   :  { %2564 = vrot.lane.b32.xlu1 %v2563_v43, %s3892_s27  ;;  %v482_v54 = vsel %vm458_vm3, %v474_v34, %v478_v49  ;;  %v480_v60 = vsel %vm477_vm7, %v478_v49, %v479_v32  ;;  %v469_v62 = vrot.slane %v2981_v28, 5  ;;  %v500_v63 = vsel %vm458_vm3, %v498_v59, %v446_v31  ;;  %v128_v28 = vld [vmem:[%s3918_s30 + $0x78] sm:$0xff]  ;;  %v125_v43 = vld [vmem:[%s3918_s30 + $0x60] sm:$0xff]  ;;  %v139_v46 = vld [vmem:[%s3918_s30 + $0xd0] sm:$0xff] }
 0x14b   :  { %v494_v56 = vsel %vm458_vm3, %v484_v42, %v488_v53  ;;  %v490_v57 = vsel %vm388_vm14, %v488_v53, %v489_v55  ;;  %v491_v0 = vrot.slane %v448_v58, 7  ;;  %v141_v42 = vld [vmem:[%s3918_s30 + $0xe0] sm:$0xff]  ;;  %v122_v49 = vld [vmem:[%s3918_s30 + $0x48] sm:$0xff]  ;;  %v120_v53 = vld [vmem:[%s3918_s30 + $0x38] sm:$0xff] }
 0x14c   :  { %528 = vrot.lane.b32.xlu0 %v485_v48, %s2640_s3  ;;  %v470_v1 = vsel %vm3898_vm8, %v468_v37, %v469_v62  ;;  %v144_v37 = vld [vmem:[%s3918_s30 + $0xf8] sm:$0xff]  ;;  %v138_v48 = vld [vmem:[%s3918_s30 + $0xc8] sm:$0xff]  ;;  %v133_v59 = vld [vmem:[%s3918_s30 + $0xa0] sm:$0xff]  ;;  %vm695_vm8 = vcmask 525312  }
 0x14d   :  { %v492_v61 = vsel %vm388_vm14, %v489_v55, %v491_v0  ;;  %2334 = vmatprep.subr.mxu0 %v144_v37  ;;  %v119_v55 = vld [vmem:[%s3918_s30 + $0x30] sm:$0xff] }
 0x14e   :  { %541 = vrot.lane.b32.xlu1 %v497_v52, %s2637_s2  ;;  %2335 = vmatpush3.msra.mxu0 %v128_v28  ;;  %v136_v52 = vld [vmem:[%s3918_s30 + $0xb8] sm:$0xff] }
 0x14f   :  { %2336 = vmatprep.subr.mxu0 %v143_v38 }
 0x150   :  { %517 = vrot.lane.b32.xlu0 %v482_v54, %s2638_s26  ;;  %2337 = vmatpush3.msra.mxu0 %v127_v39  ;;  %v135_v54 = vld [vmem:[%s3918_s30 + $0xb0] sm:$0xff] }
 0x151   :  { %2338 = vmatprep.subr.mxu0 %v142_v40 }
 0x152   :  { %530 = vrot.lane.b32.xlu1 %v494_v56, %s2640_s3  ;;  %2339 = vmatpush3.msra.mxu0 %v126_v41  ;;  %v134_v56 = vld [vmem:[%s3918_s30 + $0xa8] sm:$0xff] }
 0x153   :  { %2340 = vmatprep.subr.mxu0 %v141_v42 }
 0x154   :  { %532 = vrot.lane.b32.xlu0 %v490_v57, %s2640_s3  ;;  %2341 = vmatpush3.msra.mxu0 %v125_v43 }
 0x155   :  { %2342 = vmatprep.subr.mxu0 %v140_v44 }
 0x156   :  { %519 = vrot.lane.b32.xlu1 %v480_v60, %s2638_s26  ;;  %2343 = vmatpush3.msra.mxu0 %v124_v45 }
 0x157   :  { %2344 = vmatprep.subr.mxu0 %v139_v46 }
 0x158   :  { %543 = vrot.lane.b32.xlu0 %v500_v63, %s2637_s2 }
 0x15a   :  { %506 = vrot.lane.b32.xlu1 %v470_v1, %s3892_s27 }
 0x15c   :  { %534 = vrot.lane.b32.xlu0 %v492_v61, %s2640_s3 }
 0x15e   :  { %508 = vrot.lane.b32.xlu1 %v469_v62, %s3892_s27  ;;  %s3919_s27 = sld [smem:[#allocation12_spill]] }
 0x160   :  { %547 = vrot.lane.b32.xlu0 %v448_v58, %s2637_s2  ;;  %v118_v58 = vld [vmem:[%s3918_s30 + $0x28] sm:$0xff] }
 0x164   :  { %v2284_v57 = vld [vmem:[%s3919_s27] ss:$0 sm:$0xff]  ;;  %s3899_s27 = smov 69  }
 0x1b6   :  { %v546_v3 = vpop.permute.xlu0 %545 }
 0x1b8   :  { %v522_v4 = vpop.permute.xlu1 %521 }
 0x1ba   :  { %v516_v5 = vpop.permute.xlu0 %515 }
 0x1bc   :  { %v2565_v6 = vpop.permute.xlu1 %2564 }
 0x1bd   :  { %v2566_v7 = vunpack.i.l.bf16 %v2565_v6  ;;  %v2567_v17 = vunpack.i.h.bf16 %v2565_v6 }
 0x1be   :  { %v529_v8 = vpop.permute.xlu0 %528 }
 0x1bf   :  { %v553_v9 = vsel %vm345_vm4, %v2983_v29, %v2566_v7  ;;  %v563_v10 = vsel %vm3897_vm9, %v516_v5, %v529_v8  ;;  %v554_v23 = vsel %vm345_vm4, %v459_v50, %v2567_v17  ;;  %v137_v50 = vld [vmem:[%s3918_s30 + $0xc0] sm:$0xff] }
 0x1c0   :  { %v542_v11 = vpop.permute.xlu1 %541  ;;  %v558_v14 = vsel %vm3894_vm12, %v553_v9, %v516_v5 }
 0x1c1   :  { %v568_v12 = vsel %vm3896_vm10, %v563_v10, %v542_v11 }
 0x1c2   :  { %v518_v13 = vpop.permute.xlu0 %517  ;;  %2286 = vmatprep.mubr.msk.f32.mxu1 %vm3895_vm11, %v568_v12 }
 0x1c3   :  { %659 = vmatmul.mubr.f32.vlgmr.msra.gmra.mxu1 %v558_v14  ;;  %v559_v25 = vsel %vm3894_vm12, %v554_v23, %v518_v13 }
 0x1c4   :  { %v531_v15 = vpop.permute.xlu1 %530 }
 0x1c5   :  { %v564_v19 = vsel %vm3897_vm9, %v518_v13, %v531_v15 }
 0x1c6   :  { %v533_v16 = vpop.permute.xlu0 %532 }
 0x1c8   :  { %v520_v18 = vpop.permute.xlu1 %519 }
 0x1c9   :  { %v565_v20 = vsel %vm3897_vm9, %v520_v18, %v533_v16 }
 0x1ca   :  { %v544_v21 = vpop.permute.xlu0 %543  ;;  %v570_v27 = vsel %vm3896_vm10, %v565_v20, %v546_v3 }
 0x1cb   :  { %v569_v22 = vsel %vm3896_vm10, %v564_v19, %v544_v21 }
 0x1cc   :  { %v507_v24 = vpop.permute.xlu1 %506  ;;  %2287 = vmatprep.mubr.msk.f32.mxu1 %vm3895_vm11, %v569_v22 }
 0x1cd   :  { %v555_v26 = vsel %vm345_vm4, %v454_v51, %v507_v24  ;;  %664 = vmatmul.mubr.f32.gmra.mxu1 %v559_v25  ;;  %v121_v51 = vld [vmem:[%s3918_s30 + $0x40] sm:$0xff] }
 0x1ce   :  { %v535_v29 = vpop.permute.xlu0 %534  ;;  %2288 = vmatprep.mubr.msk.f32.mxu1 %vm3895_vm11, %v570_v27  ;;  %v560_v31 = vsel %vm3894_vm12, %v555_v26, %v520_v18 }
 0x1cf   :  { %v566_v33 = vsel %vm3897_vm9, %v522_v4, %v535_v29 }
 0x1d0   :  { %v509_v30 = vpop.permute.xlu1 %508 }
 0x1d1   :  { %v556_v32 = vsel %vm345_vm4, %v453_v47, %v509_v30  ;;  %669 = vmatmul.mubr.f32.gmra.mxu1 %v560_v31  ;;  %v123_v47 = vld [vmem:[%s3918_s30 + $0x50] sm:$0xff] }
 0x1d2   :  { %v548_v34 = vpop.permute.xlu0 %547  ;;  %v561_v36 = vsel %vm3894_vm12, %v556_v32, %v522_v4  ;;  %2345 = vmatpush3.msra.mxu0 %v123_v47 }
 0x1d3   :  { %v571_v35 = vsel %vm3896_vm10, %v566_v33, %v548_v34  ;;  %2346 = vmatprep.subr.mxu0 %v138_v48 }
 0x1d4   :  { %2289 = vmatprep.mubr.msk.f32.mxu1 %vm3895_vm11, %v571_v35  ;;  %2347 = vmatpush3.msra.mxu0 %v122_v49  ;;  %vm691_vm11 = vcmask 531456  }
 0x1d5   :  { %674 = vmatmul.mubr.f32.gmra.mxu1 %v561_v36  ;;  %2348 = vmatprep.subr.mxu0 %v137_v50  ;;  %v117_v50 = vld [vmem:[%s3918_s30 + $0x20] sm:$0xff] }
 0x1d6   :  { %2349 = vmatpush3.msra.mxu0 %v121_v51  ;;  %v132_v51 = vld [vmem:[%s3918_s30 + $0x98] sm:$0xff] }
 0x1d7   :  { %2350 = vmatprep.subr.mxu0 %v136_v52  ;;  %v116_v52 = vld [vmem:[%s3918_s30 + $0x18] sm:$0xff] }
 0x1d8   :  { %2351 = vmatpush3.msra.mxu0 %v120_v53  ;;  %v131_v53 = vld [vmem:[%s3918_s30 + $0x90] sm:$0xff] }
 0x1d9   :  { %2352 = vmatprep.subr.mxu0 %v135_v54  ;;  %v115_v54 = vld [vmem:[%s3918_s30 + $0x10] sm:$0xff] }
 0x1da   :  { %2353 = vmatpush3.msra.mxu0 %v119_v55  ;;  %v130_v55 = vld [vmem:[%s3918_s30 + $0x88] sm:$0xff] }
 0x1db   :  { %2354 = vmatprep.subr.mxu0 %v134_v56  ;;  %v114_v56 = vld [vmem:[%s3918_s30 + $0x8] sm:$0xff] }
 0x1dc   :  { %2355 = vmatpush3.msra.mxu0 %v118_v58 }
 0x1dd   :  { %2356 = vmatprep.subr.mxu0 %v133_v59  ;;  %v113_v59 = vld [vmem:[%s3918_s30] sm:$0xff] }
 0x1de   :  { %2357 = vmatpush3.msra.mxu0 %v117_v50  ;;  %v145_v50 = vld [vmem:[%s3918_s30 + $0x100] sm:$0xff] }
 0x1df   :  { %2358 = vmatprep.subr.mxu0 %v132_v51 }
 0x1e0   :  { %2359 = vmatpush3.msra.mxu0 %v116_v52 }
 0x1e1   :  { %2360 = vmatprep.subr.mxu0 %v131_v53  ;;  %v161_v53 = vld [vmem:[%s3918_s30 + $0x180] sm:$0x3f] }
 0x1e2   :  { %2361 = vmatpush3.msra.mxu0 %v115_v54 }
 0x1e3   :  { %2362 = vmatprep.subr.mxu0 %v130_v55  ;;  %v168_v55 = vld [vmem:[%s3873_s8 + $0x28] sm:$0x1f] }
 0x1e4   :  { %2363 = vmatpush3.msra.mxu0 %v114_v56  ;;  %v167_v56 = vld [vmem:[%s3873_s8 + $0x20] sm:$0xff] }
 0x283   :  { %v660_v60 = vpop.f32.mrf.mxu1 }
 0x284   :  { %v661_v62 = vadd.f32 %v2284_v57, %v660_v60 }
 0x285   :  { %v662_v63 = vpop.f32.mrf.mxu1 }
 0x286   :  { %vm679_vm12 = vcmp.gt.f32.partialorder %v661_v62, 0.0  ;;  %v683_v0 = vmul.f32 0.01, %v661_v62 }
 0x288   :  { %v687_v1 = vsel %vm679_vm12, %v661_v62, %v683_v0 }
 0x289   :  { %692 = vst.msk [vmem:[#allocation3] sm:$0xff] %vm691_vm11, %v687_v1 }
 0x28d   :  { %v665_v61 = vpop.f32.mrf.mxu1 }
 0x28e   :  { %v666_v3 = vadd.f32 %v2284_v57, %v665_v61 }
 0x28f   :  { %v667_v4 = vpop.f32.mrf.mxu1 }
 0x290   :  { %vm680_vm10 = vcmp.gt.f32.partialorder %v666_v3, 0.0  ;;  %v684_v5 = vmul.f32 0.01, %v666_v3 }
 0x291   :  { %v670_v6 = vpop.f32.mrf.mxu1 }
 0x292   :  { %v688_v7 = vsel %vm680_vm10, %v666_v3, %v684_v5  ;;  %v671_v8 = vadd.f32 %v2284_v57, %v670_v6  ;;  %vm711_vm10 = vcmask 527360  }
 0x293   :  { %693 = vst.msk [vmem:[#allocation3 + $0x8] sm:$0xff] %vm691_vm11, %v688_v7  ;;  %v672_v9 = vpop.f32.mrf.mxu1 }
 0x294   :  { %vm681_vm9 = vcmp.gt.f32.partialorder %v671_v8, 0.0  ;;  %v685_v10 = vmul.f32 0.01, %v671_v8 }
 0x295   :  { %v675_v11 = vpop.f32.mrf.mxu1 }
 0x296   :  { %v689_v12 = vsel %vm681_vm9, %v671_v8, %v685_v10  ;;  %v676_v13 = vadd.f32 %v2284_v57, %v675_v11  ;;  %v129_v57 = vld [vmem:[%s3918_s30 + $0x80] sm:$0xff]  ;;  %vm3902_vm9 = vcmask 15360  }
 0x297   :  { %694 = vst.msk [vmem:[#allocation3 + $0x10] sm:$0xff] %vm691_vm11, %v689_v12  ;;  %v677_v14 = vpop.f32.mrf.mxu1  ;;  %2364 = vmatprep.subr.mxu0 %v129_v57  ;;  %v166_v57 = vld [vmem:[%s3873_s8 + $0x18] sm:$0xff] }
 0x298   :  { %vm682_vm12 = vcmp.gt.f32.partialorder %v676_v13, 0.0  ;;  %v686_v15 = vmul.f32 0.01, %v676_v13  ;;  %2365 = vmatpush3.msra.mxu0 %v113_v59  ;;  %v164_v59 = vld [vmem:[%s3873_s8 + $0x8] sm:$0xff] }
 0x299   :  { %888 = vmatprep.subr.mxu0 %v2635_v2 }
 0x29a   :  { %v690_v16 = vsel %vm682_vm12, %v676_v13, %v686_v15  ;;  %v697_v17 = vld [vmem:[#allocation3] ss:$2 sm:$0x3f]  ;;  %v699_v18 = vld [vmem:[#allocation3 + $0x1] ss:$2 sm:$0x3f] }
 0x29b   :  { %696 = vst.msk [vmem:[#allocation3 + $0x18] sm:$0x3] %vm695_vm8, %v690_v16  ;;  %v700_v22 = vmax.f32 %v697_v17, %v699_v18  ;;  %vm3901_vm12 = vcmask 547840  }
 0x29e   :  { %v702_v19 = vld [vmem:[#allocation3 + $0xd] ss:$2 sm:$0x3f] }
 0x2a2   :  { %v704_v20 = vld [vmem:[#allocation3 + $0xe] ss:$2 sm:$0x3f] }
 0x2a3   :  { %v705_v21 = vmax.f32 %v702_v19, %v704_v20 }
 0x2a5   :  { %v707_v23 = vrot.slane %v705_v21, 2 }
 0x2a7   :  { %v709_v24 = vsel %vm204_vm0, %v700_v22, %v707_v23  ;;  %v712_v25 = vsel %vm711_vm10, %v707_v23, 0.0 }
 0x2a8   :  { %v710_v26 = vsel %vm691_vm11, %v709_v24, 0.0 }
 0x2a9   :  { %v713_v27 = vadd.f32 %v712_v25, %v710_v26  ;;  %v160_v25 = vld [vmem:[%s3918_s30 + $0x178] sm:$0xff] }
 0x2ab   :  { %v714_v29 = vrot.slane %v713_v27, 4 }
 0x2ad   :  { %v715_v30 = vadd.f32 %v714_v29, %v713_v27 }
 0x2af   :  { %v716_v31 = vrot.slane %v715_v30, 2 }
 0x2b1   :  { %v717_v32 = vadd.f32 %v716_v31, %v715_v30  ;;  %v159_v30 = vld [vmem:[%s3918_s30 + $0x170] sm:$0xff] }
 0x2b3   :  { %v718_v33 = vrot.slane %v717_v32, 1 }
 0x2b5   :  { %v719_v34 = vadd.f32 %v718_v33, %v717_v32  ;;  %v158_v33 = vld [vmem:[%s3918_s30 + $0x168] sm:$0xff] }
 0x2b7   :  { %v721_v35 = vmul.f32 0.083333336, %v719_v34  ;;  %v157_v34 = vld [vmem:[%s3918_s30 + $0x160] sm:$0xff] }
 0x2b9   :  { %v722_v36 = vsub.f32 %v709_v24, %v721_v35  ;;  %v723_v37 = vsub.f32 %v707_v23, %v721_v35  ;;  %v156_v35 = vld [vmem:[%s3918_s30 + $0x158] sm:$0xff] }
 0x2bb   :  { %v724_v28 = vmul.f32 %v722_v36, %v722_v36  ;;  %v725_v38 = vmul.f32 %v723_v37, %v723_v37 }
 0x2bd   :  { %v726_v39 = vsel %vm691_vm11, %v724_v28, 0.0  ;;  %v727_v40 = vsel %vm711_vm10, %v725_v38, 0.0  ;;  %v153_v28 = vld [vmem:[%s3918_s30 + $0x140] sm:$0xff]  ;;  %v152_v38 = vld [vmem:[%s3918_s30 + $0x138] sm:$0xff] }
 0x2be   :  { %v728_v41 = vadd.f32 %v727_v40, %v726_v39  ;;  %v151_v39 = vld [vmem:[%s3918_s30 + $0x130] sm:$0xff]  ;;  %v150_v40 = vld [vmem:[%s3918_s30 + $0x128] sm:$0xff] }
 0x2c0   :  { %v729_v42 = vrot.slane %v728_v41, 4 }
 0x2c2   :  { %v730_v43 = vadd.f32 %v729_v42, %v728_v41  ;;  %v149_v42 = vld [vmem:[%s3918_s30 + $0x120] sm:$0xff] }
 0x2c4   :  { %v731_v44 = vrot.slane %v730_v43, 2 }
 0x2c6   :  { %v732_v45 = vadd.f32 %v731_v44, %v730_v43  ;;  %v148_v43 = vld [vmem:[%s3918_s30 + $0x118] sm:$0xff] }
 0x2c8   :  { %v733_v46 = vrot.slane %v732_v45, 1 }
 0x2ca   :  { %v734_v47 = vadd.f32 %v733_v46, %v732_v45  ;;  %v147_v46 = vld [vmem:[%s3918_s30 + $0x110] sm:$0xff] }
 0x2cc   :  { %v735_v48 = vmul.f32 0.083333336, %v734_v47 }
 0x2ce   :  { %v736_v49 = vadd.f32 1e-05, %v735_v48  ;;  %v146_v48 = vld [vmem:[%s3918_s30 + $0x108] sm:$0xff] }
 0x2d0   :  { %2595 = vrsqrt.f32 %v736_v49 }
 0x2dd   :  { %v2596_v58 = vpop.eup %2595 }
 0x2de   :  { %v738_v60 = vmul.f32 %v2596_v58, %v722_v36  ;;  %v739_v62 = vmul.f32 %v2596_v58, %v723_v37  ;;  %v155_v36 = vld [vmem:[%s3918_s30 + $0x150] sm:$0xff]  ;;  %v154_v37 = vld [vmem:[%s3918_s30 + $0x148] sm:$0xff] }
 0x2df   :  { %v165_v58 = vld [vmem:[%s3873_s8 + $0x10] sm:$0xff] }
 0x2e0   :  { %v741_v63 = vrot.slane %v738_v60, 1  ;;  %v745_v0 = vrot.slane %v738_v60, 2  ;;  %v771_v1 = vrot.slane %v739_v62, 2  ;;  %v775_v3 = vrot.slane %v739_v62, 3 }
 0x2e1   :  { %v753_v4 = vrot.slane %v738_v60, 4  ;;  %v779_v5 = vrot.slane %v739_v62, 4  ;;  %v749_v6 = vrot.slane %v738_v60, 3  ;;  %v783_v8 = vrot.slane %v739_v62, 5 }
 0x2e2   :  { %742 = vrot.lane.b32.xlu1 %v741_v63, %s2641_s1  ;;  %v2568_v61 = vpack.i.bf16 %v745_v0, %v771_v1  ;;  %v757_v9 = vrot.slane %v738_v60, 5  ;;  %v2290_v1 = vld [vmem:[%s3872_s7] ss:$0 sm:$0xff] }
 0x2e3   :  { %v2573_v7 = vpack.i.bf16 %v753_v4, %v779_v5 }
 0x2e4   :  { %2569 = vrot.lane.b32.xlu0 %v2568_v61, %s2642_s5 }
 0x2e6   :  { %776 = vrot.lane.b32.xlu1 %v775_v3, %s2643_s24 }
 0x2e8   :  { %750 = vrot.lane.b32.xlu0 %v749_v6, %s2643_s24 }
 0x2ea   :  { %2574 = vrot.lane.b32.xlu1 %v2573_v7, %s2644_s6 }
 0x2ec   :  { %784 = vrot.lane.b32.xlu0 %v783_v8, %s3899_s27 }
 0x2ee   :  { %758 = vrot.lane.b32.xlu1 %v757_v9, %s3899_s27 }
 0x354   :  { %v743_v10 = vpop.permute.xlu1 %742 }
 0x355   :  { %v761_v12 = vsel %vm691_vm11, %v738_v60, %v743_v10  ;;  %v163_v60 = vld [vmem:[%s3873_s8] sm:$0xff] }
 0x356   :  { %v2570_v11 = vpop.permute.xlu0 %2569  ;;  %v794_v18 = vrot.slane %v761_v12, 5 }
 0x357   :  { %v2572_v13 = vunpack.i.h.bf16 %v2570_v11  ;;  %v2571_v14 = vunpack.i.l.bf16 %v2570_v11 }
 0x358   :  { %v777_v15 = vpop.permute.xlu1 %776  ;;  %v802_v27 = vsel %vm388_vm14, %v761_v12, %v794_v18 }
 0x359   :  { %v787_v16 = vsel %vm3902_vm9, %v743_v10, %v2571_v14  ;;  %v763_v17 = vsel %vm3902_vm9, %v743_v10, %v2572_v13  ;;  %vm3903_vm9 = vcmask 564224  }
 0x35a   :  { %v788_v19 = vsel %vm3901_vm12, %v787_v16, %v777_v15  ;;  %v751_v20 = vpop.permute.xlu0 %750 }
 0x35b   :  { %v795_v21 = vrot.slane %v788_v19, 5  ;;  %v765_v22 = vsel %vm3901_vm12, %v763_v17, %v751_v20  ;;  %vm3904_vm12 = vcmask 31744  }
 0x35c   :  { %v2575_v23 = vpop.permute.xlu1 %2574 }
 0x35d   :  { %v803_v24 = vsel %vm388_vm14, %v765_v22, %v795_v21  ;;  %v2576_v41 = vunpack.i.l.bf16 %v2575_v23  ;;  %v2577_v44 = vunpack.i.h.bf16 %v2575_v23 }
 0x35e   :  { %v785_v26 = vpop.permute.xlu0 %784  ;;  %882 = vmatprep.mubr.f32.mxu0 %v803_v24 }
 0x35f   :  { %v797_v29 = vrot.slane %v785_v26, 5  ;;  %883 = vmatmul.mubr.f32.vlgmr.msra.gmra.mxu0 %v802_v27  ;;  %v789_v45 = vsel %vm3904_vm12, %v777_v15, %v2576_v41  ;;  %v767_v49 = vsel %vm3904_vm12, %v751_v20, %v2577_v44  ;;  %v3347_v41 = vld [vmem:[%s3876_s11] ss:$0 sm:$0xff] }
 0x360   :  { %889 = vmatpush1.msra.mxu0 %v160_v25  ;;  %v759_v31 = vpop.permute.xlu1 %758  ;;  %v790_v47 = vsel %vm3903_vm9, %v789_v45, %v785_v26 }
 0x361   :  { %890 = vmatprep.subr.mxu0 %v2635_v2  ;;  %v805_v32 = vsel %vm388_vm14, %v759_v31, %v797_v29  ;;  %v796_v51 = vrot.slane %v790_v47, 5  ;;  %v769_v52 = vsel %vm3903_vm9, %v767_v49, %v759_v31  ;;  %v1065_v31 = vld [vmem:[%s3920_s0] sm:$0xff] }
 0x362   :  { %891 = vmatpush1.msra.mxu0 %v159_v30  ;;  %2292 = vmatprep.mubr.msk.f32.mxu0 %vm3905_vm2, %v805_v32  ;;  %v1074_v30 = vld [vmem:[%s3875_s10] sm:$0x3f]  ;;  %v1066_v32 = vld [vmem:[%s3920_s0 + $0x8] sm:$0xff] }
 0x363   :  { %892 = vmatprep.subr.mxu0 %v2635_v2  ;;  %v804_v54 = vsel %vm388_vm14, %v769_v52, %v796_v51 }
 0x364   :  { %893 = vmatpush1.msra.mxu0 %v158_v33  ;;  %v1067_v33 = vld [vmem:[%s3920_s0 + $0x10] sm:$0xff] }
 0x365   :  { %894 = vmatprep.subr.mxu0 %v2635_v2 }
 0x366   :  { %895 = vmatpush1.msra.mxu0 %v157_v34  ;;  %v1068_v34 = vld [vmem:[%s3920_s0 + $0x18] sm:$0xff] }
 0x367   :  { %896 = vmatprep.subr.mxu0 %v2635_v2 }
 0x368   :  { %897 = vmatpush1.msra.mxu0 %v156_v35  ;;  %v1069_v35 = vld [vmem:[%s3920_s0 + $0x20] sm:$0xff] }
 0x369   :  { %898 = vmatprep.subr.mxu0 %v2635_v2 }
 0x36a   :  { %899 = vmatpush1.msra.mxu0 %v155_v36  ;;  %v1070_v36 = vld [vmem:[%s3920_s0 + $0x28] sm:$0xff] }
 0x36b   :  { %900 = vmatprep.subr.mxu0 %v2635_v2 }
 0x36c   :  { %901 = vmatpush1.msra.mxu0 %v154_v37  ;;  %v1071_v37 = vld [vmem:[%s3920_s0 + $0x30] sm:$0xff] }
 0x36d   :  { %902 = vmatprep.subr.mxu0 %v2635_v2 }
 0x36e   :  { %903 = vmatpush1.msra.mxu0 %v153_v28  ;;  %v1072_v28 = vld [vmem:[%s3920_s0 + $0x38] sm:$0xff] }
 0x36f   :  { %904 = vmatprep.subr.mxu0 %v2635_v2 }
 0x370   :  { %905 = vmatpush1.msra.mxu0 %v152_v38  ;;  %v1073_v38 = vld [vmem:[%s3920_s0 + $0x40] sm:$0x3f] }
 0x371   :  { %906 = vmatprep.subr.mxu0 %v2635_v2 }
 0x372   :  { %907 = vmatpush1.msra.mxu0 %v151_v39 }
 0x373   :  { %908 = vmatprep.subr.mxu0 %v2635_v2 }
 0x374   :  { %909 = vmatpush1.msra.mxu0 %v150_v40 }
 0x375   :  { %910 = vmatprep.subr.mxu0 %v2635_v2 }
 0x376   :  { %911 = vmatpush1.msra.mxu0 %v149_v42 }
 0x377   :  { %912 = vmatprep.subr.mxu0 %v2635_v2 }
 0x378   :  { %913 = vmatpush1.msra.mxu0 %v148_v43 }
 0x379   :  { %914 = vmatprep.subr.mxu0 %v2635_v2 }
 0x37a   :  { %915 = vmatpush1.msra.mxu0 %v147_v46 }
 0x37b   :  { %916 = vmatprep.subr.mxu0 %v2635_v2 }
 0x37c   :  { %917 = vmatpush1.msra.mxu0 %v146_v48 }
 0x37d   :  { %918 = vmatprep.subr.mxu0 %v2635_v2 }
 0x37e   :  { %919 = vmatpush1.msra.mxu0 %v145_v50 }
 0x37f   :  { %950 = vmatprep.subr.mxu0 %v2635_v2 }
 0x380   :  { %2291 = vmatpush2.msk.msra.mxu0 %vm204_vm0, %v161_v53 }
 0x381   :  { %953 = vmatmul.mubr.f32.vlgmr.msra.gmra.mxu0 %v804_v54  ;;  %2468 = vmatprep.subr.mxu0 %v2635_v2 }
 0x382   :  { %2480 = vmatprep.mubr.msk.f32.mxu0 %vm2636_vm1, %v2635_v2  ;;  %2469 = vmatpush3.msk.msra.mxu0 %vm458_vm3, %v168_v55 }
 0x383   :  { %2470 = vmatprep.subr.mxu0 %v2635_v2 }
 0x384   :  { %2471 = vmatpush3.msra.mxu0 %v167_v56 }
 0x385   :  { %2472 = vmatprep.subr.mxu0 %v2635_v2 }
 0x386   :  { %2473 = vmatpush3.msra.mxu0 %v166_v57 }
 0x387   :  { %2474 = vmatprep.subr.mxu0 %v2635_v2 }
 0x388   :  { %2475 = vmatpush3.msra.mxu0 %v165_v58 }
 0x389   :  { %2476 = vmatprep.subr.mxu0 %v2635_v2 }
 0x38a   :  { %2477 = vmatpush3.msra.mxu0 %v164_v59 }
 0x38b   :  { %2478 = vmatprep.subr.mxu0 %v2635_v2 }
 0x38c   :  { %2479 = vmatpush3.msra.mxu0 %v163_v60 }
 0x38d   :  { %2483 = vmatprep.subr.mxu0 %v2635_v2 }
 0x41f   :  { %v2366_v62 = vpop.f32.mrf.mxu0 }
 0x421   :  { %v2367_v63 = vpop.f32.mrf.mxu0 }
 0x422   :  { %v2368_v0 = vadd.f32 %v2367_v63, %v2366_v62  ;;  %v1091_v63 = vld [vmem:[%s3877_s12 + $0x78] sm:$0xff] }
 0x423   :  { %1561 = vmatpush1.msra.mxu1 %v1091_v63 }
 0x424   :  { %v885_v61 = vadd.f32 %v2368_v0, %v2290_v1  ;;  %v1090_v0 = vld [vmem:[%s3877_s12 + $0x70] sm:$0xff]  ;;  %1562 = vmatprep.subr.mxu1 %v2635_v2 }
 0x425   :  { %1563 = vmatpush1.msra.mxu1 %v1090_v0 }
 0x426   :  { %1564 = vmatprep.subr.mxu1 %v2635_v2 }
 0x441   :  { %v954_v3 = vpop.f32.mrf.mxu0 }
 0x442   :  { %v955_v4 = vadd.f32 %v954_v3, %v885_v61 }
 0x443   :  { %v956_v5 = vpop.f32.mrf.mxu0 }
 0x444   :  { %vm958_vm9 = vcmp.gt.f32.partialorder %v955_v4, 0.0  ;;  %v959_v6 = vmul.f32 0.01, %v955_v4 }
 0x446   :  { %v960_v7 = vsel %vm958_vm9, %v955_v4, %v959_v6  ;;  %v1089_v4 = vld [vmem:[%s3877_s12 + $0x68] sm:$0xff] }
 0x447   :  { %v961_v8 = vsel %vm405_vm15, %v960_v7, 0.0  ;;  %1565 = vmatpush1.msra.mxu1 %v1089_v4 }
 0x448   :  { %v962_v9 = vrot.slane %v961_v8, 4  ;;  %1566 = vmatprep.subr.mxu1 %v2635_v2 }
 0x44a   :  { %v963_v10 = vadd.f32 %v962_v9, %v961_v8 }
 0x44c   :  { %v964_v11 = vrot.slane %v963_v10, 2 }
 0x44e   :  { %v965_v12 = vadd.f32 %v964_v11, %v963_v10  ;;  %v1087_v11 = vld [vmem:[%s3877_s12 + $0x58] sm:$0xff] }
 0x450   :  { %v966_v13 = vrot.slane %v965_v12, 1 }
 0x452   :  { %v967_v14 = vadd.f32 %v966_v13, %v965_v12 }
 0x454   :  { %v969_v15 = vmul.f32 0.5, %v967_v14  ;;  %v1086_v14 = vld [vmem:[%s3877_s12 + $0x50] sm:$0xff] }
 0x456   :  { %v970_v16 = vsub.f32 %v960_v7, %v969_v15  ;;  %v1088_v7 = vld [vmem:[%s3877_s12 + $0x60] sm:$0xff] }
 0x457   :  { %1567 = vmatpush1.msra.mxu1 %v1088_v7 }
 0x458   :  { %v971_v17 = vmul.f32 %v970_v16, %v970_v16  ;;  %1568 = vmatprep.subr.mxu1 %v2635_v2 }
 0x459   :  { %1569 = vmatpush1.msra.mxu1 %v1087_v11  ;;  %v1101_v11 = vld [vmem:[%s3877_s12 + $0xc8] sm:$0xff] }
 0x45a   :  { %v972_v18 = vsel %vm405_vm15, %v971_v17, 0.0  ;;  %1570 = vmatprep.subr.mxu1 %v2635_v2 }
 0x45b   :  { %v973_v19 = vrot.slane %v972_v18, 4  ;;  %1571 = vmatpush1.msra.mxu1 %v1086_v14  ;;  %v1100_v14 = vld [vmem:[%s3877_s12 + $0xc0] sm:$0xff] }
 0x45c   :  { %1572 = vmatprep.subr.mxu1 %v2635_v2 }
 0x45d   :  { %v974_v20 = vadd.f32 %v973_v19, %v972_v18  ;;  %v1085_v18 = vld [vmem:[%s3877_s12 + $0x48] sm:$0xff] }
 0x45e   :  { %1573 = vmatpush1.msra.mxu1 %v1085_v18  ;;  %v1098_v18 = vld [vmem:[%s3877_s12 + $0xb0] sm:$0xff] }
 0x45f   :  { %v975_v21 = vrot.slane %v974_v20, 2  ;;  %1574 = vmatprep.subr.mxu1 %v2635_v2 }
 0x461   :  { %v976_v22 = vadd.f32 %v975_v21, %v974_v20  ;;  %v1084_v21 = vld [vmem:[%s3877_s12 + $0x40] sm:$0xff] }
 0x462   :  { %1575 = vmatpush1.msra.mxu1 %v1084_v21 }
 0x463   :  { %v977_v23 = vrot.slane %v976_v22, 1  ;;  %1576 = vmatprep.subr.mxu1 %v2635_v2 }
 0x465   :  { %v978_v24 = vadd.f32 %v977_v23, %v976_v22 }
 0x467   :  { %v979_v25 = vmul.f32 0.5, %v978_v24 }
 0x469   :  { %v980_v26 = vadd.f32 1e-05, %v979_v25  ;;  %v1083_v25 = vld [vmem:[%s3877_s12 + $0x38] sm:$0xff] }
 0x46a   :  { %1577 = vmatpush1.msra.mxu1 %v1083_v25 }
 0x46b   :  { %2597 = vrsqrt.f32 %v980_v26  ;;  %1578 = vmatprep.subr.mxu1 %v2635_v2 }
 0x478   :  { %v2598_v27 = vpop.eup %2597 }
 0x479   :  { %v982_v29 = vmul.f32 %v2598_v27, %v970_v16 }
 0x47b   :  { %2481 = vmatmul.mubr.msk.f32.vlgmr.msra.gmra.mxu0 %vm345_vm4, %v982_v29  ;;  %v1082_v29 = vld [vmem:[%s3877_s12 + $0x30] sm:$0xff] }
 0x47c   :  { %2484 = vmatpush3.msk.msra.mxu0 %vm204_vm0, %v1074_v30  ;;  %2485 = vmatprep.mubr.msk.f32.mxu0 %vm2636_vm1, %v2635_v2 }
 0x47d   :  { %1579 = vmatpush1.msra.mxu1 %v1082_v29 }
 0x47e   :  { %1580 = vmatprep.subr.mxu1 %v2635_v2 }
 0x47f   :  { %2486 = vmatmul.mubr.msk.f32.vlgmr.msra.gmra.mxu0 %vm3905_vm2, %v1065_v31 }
 0x480   :  { %2488 = vmatprep.mubr.msk.f32.mxu0 %vm2636_vm1, %v2635_v2 }
 0x483   :  { %2489 = vmatmul.mubr.msk.f32.gmra.mxu0 %vm3905_vm2, %v1066_v32 }
 0x484   :  { %2491 = vmatprep.mubr.msk.f32.mxu0 %vm2636_vm1, %v2635_v2 }
 0x487   :  { %2492 = vmatmul.mubr.msk.f32.gmra.mxu0 %vm3905_vm2, %v1067_v33  ;;  %v1081_v33 = vld [vmem:[%s3877_s12 + $0x28] sm:$0xff] }
 0x488   :  { %2494 = vmatprep.mubr.msk.f32.mxu0 %vm2636_vm1, %v2635_v2  ;;  %1581 = vmatpush1.msra.mxu1 %v1081_v33 }
 0x489   :  { %1582 = vmatprep.subr.mxu1 %v2635_v2 }
 0x48b   :  { %2495 = vmatmul.mubr.msk.f32.gmra.mxu0 %vm3905_vm2, %v1068_v34 }
 0x48c   :  { %2497 = vmatprep.mubr.msk.f32.mxu0 %vm2636_vm1, %v2635_v2 }
 0x48f   :  { %2498 = vmatmul.mubr.msk.f32.gmra.mxu0 %vm3905_vm2, %v1069_v35  ;;  %v1080_v35 = vld [vmem:[%s3877_s12 + $0x20] sm:$0xff] }
 0x490   :  { %2500 = vmatprep.mubr.msk.f32.mxu0 %vm2636_vm1, %v2635_v2  ;;  %1583 = vmatpush1.msra.mxu1 %v1080_v35 }
 0x491   :  { %1584 = vmatprep.subr.mxu1 %v2635_v2 }
 0x493   :  { %2501 = vmatmul.mubr.msk.f32.gmra.mxu0 %vm3905_vm2, %v1070_v36 }
 0x494   :  { %2503 = vmatprep.mubr.msk.f32.mxu0 %vm2636_vm1, %v2635_v2 }
 0x497   :  { %2504 = vmatmul.mubr.msk.f32.gmra.mxu0 %vm3905_vm2, %v1071_v37 }
 0x498   :  { %2506 = vmatprep.mubr.msk.f32.mxu0 %vm2636_vm1, %v2635_v2 }
 0x49b   :  { %2507 = vmatmul.mubr.msk.f32.gmra.mxu0 %vm3905_vm2, %v1072_v28 }
 0x49c   :  { %2509 = vmatprep.mubr.msk.f32.mxu0 %vm2636_vm1, %v2635_v2 }
 0x49f   :  { %2510 = vmatmul.mubr.msk.f32.gmra.mxu0 %vm3905_vm2, %v1073_v38 }
 0x53b   :  { %v3342_v39 = vpop.f32.mrf.mxu0 }
 0x53d   :  { %v2482_v40 = vpop.f32.mrf.mxu0 }
 0x53e   :  { %v1079_v40 = vld [vmem:[%s3877_s12 + $0x18] sm:$0xff] }
 0x53f   :  { %v1265_v42 = vpop.f32.mrf.mxu0  ;;  %1585 = vmatpush1.msra.mxu1 %v1079_v40 }
 0x540   :  { %v1266_v43 = vadd.f32 %v3347_v41, %v1265_v42  ;;  %1586 = vmatprep.subr.mxu1 %v2635_v2 }
 0x541   :  { %v2487_v44 = vpop.f32.mrf.mxu0 }
 0x542   :  { %vm1309_vm9 = vcmp.gt.f32.partialorder %v1266_v43, 0.0  ;;  %v1318_v45 = vmul.f32 0.01, %v1266_v43 }
 0x543   :  { %v1270_v46 = vpop.f32.mrf.mxu0 }
 0x544   :  { %v1327_v47 = vsel %vm1309_vm9, %v1266_v43, %v1318_v45  ;;  %v1271_v48 = vadd.f32 %v3347_v41, %v1270_v46  ;;  %v1078_v43 = vld [vmem:[%s3877_s12 + $0x10] sm:$0xff] }
 0x545   :  { %1336 = vst.msk [vmem:[#allocation2] sm:$0xff] %vm345_vm4, %v1327_v47  ;;  %v2490_v49 = vpop.f32.mrf.mxu0  ;;  %1587 = vmatpush1.msra.mxu1 %v1078_v43 }
 0x546   :  { %vm1310_vm12 = vcmp.gt.f32.partialorder %v1271_v48, 0.0  ;;  %v1319_v50 = vmul.f32 0.01, %v1271_v48  ;;  %1588 = vmatprep.subr.mxu1 %v2635_v2 }
 0x547   :  { %v1275_v51 = vpop.f32.mrf.mxu0 }
 0x548   :  { %v1328_v52 = vsel %vm1310_vm12, %v1271_v48, %v1319_v50  ;;  %v1276_v53 = vadd.f32 %v3347_v41, %v1275_v51  ;;  %v1077_v50 = vld [vmem:[%s3877_s12 + $0x8] sm:$0xff] }
 0x549   :  { %1337 = vst.msk [vmem:[#allocation2 + $0x8] sm:$0xff] %vm345_vm4, %v1328_v52  ;;  %v2493_v54 = vpop.f32.mrf.mxu0  ;;  %1589 = vmatpush1.msra.mxu1 %v1077_v50 }
 0x54a   :  { %vm1311_vm2 = vcmp.gt.f32.partialorder %v1276_v53, 0.0  ;;  %v1320_v55 = vmul.f32 0.01, %v1276_v53  ;;  %v1104_v54 = vld [vmem:[%s3877_s12 + $0xe0] sm:$0x1]  ;;  %1590 = vmatprep.subr.mxu1 %v2635_v2 }
 0x54b   :  { %v1280_v56 = vpop.f32.mrf.mxu0 }
 0x54c   :  { %v1329_v57 = vsel %vm1311_vm2, %v1276_v53, %v1320_v55  ;;  %v1281_v58 = vadd.f32 %v3347_v41, %v1280_v56  ;;  %v1076_v53 = vld [vmem:[%s3877_s12] sm:$0xff] }
 0x54d   :  { %1338 = vst.msk [vmem:[#allocation2 + $0x10] sm:$0xff] %vm345_vm4, %v1329_v57  ;;  %v2496_v59 = vpop.f32.mrf.mxu0  ;;  %1591 = vmatpush1.msra.mxu1 %v1076_v53  ;;  %v1097_v53 = vld [vmem:[%s3877_s12 + $0xa8] sm:$0xff] }
 0x54e   :  { %vm1312_vm9 = vcmp.gt.f32.partialorder %v1281_v58, 0.0  ;;  %v1321_v60 = vmul.f32 0.01, %v1281_v58  ;;  %1598 = vmatprep.subr.mxu1 %v2635_v2 }
 0x54f   :  { %v1285_v62 = vpop.f32.mrf.mxu0  ;;  %2308 = vmatpush2.msk.msra.mxu1 %vm388_vm14, %v1104_v54  ;;  %v1096_v54 = vld [vmem:[%s3877_s12 + $0xa0] sm:$0xff] }
 0x550   :  { %v1330_v1 = vsel %vm1312_vm9, %v1281_v58, %v1321_v60  ;;  %v1286_v61 = vadd.f32 %v3347_v41, %v1285_v62  ;;  %v1345_v46 = vld [vmem:[#allocation2] ss:$2 sm:$0xff]  ;;  %v1348_v47 = vld [vmem:[#allocation2 + $0x1] ss:$2 sm:$0xff]  ;;  %1600 = vmatprep.subr.mxu1 %v2635_v2 }
 0x551   :  { %1339 = vst.msk [vmem:[#allocation2 + $0x18] sm:$0xff] %vm345_vm4, %v1330_v1  ;;  %v2499_v3 = vpop.f32.mrf.mxu0  ;;  %v1351_v52 = vmax.f32 %v1345_v46, %v1348_v47 }
 0x552   :  { %vm1313_vm2 = vcmp.gt.f32.partialorder %v1286_v61, 0.0  ;;  %v1322_v5 = vmul.f32 0.01, %v1286_v61 }
 0x553   :  { %v1290_v6 = vpop.f32.mrf.mxu0  ;;  %v1375_v0 = vsel %vm345_vm4, %v1351_v52, 0.0 }
 0x554   :  { %v1331_v8 = vsel %vm1313_vm2, %v1286_v61, %v1322_v5  ;;  %v1291_v9 = vadd.f32 %v3347_v41, %v1290_v6  ;;  %v1103_v61 = vld [vmem:[%s3877_s12 + $0xd8] sm:$0xff]  ;;  %v1102_v6 = vld [vmem:[%s3877_s12 + $0xd0] sm:$0xff] }
 0x555   :  { %1340 = vst.msk [vmem:[#allocation2 + $0x20] sm:$0xff] %vm345_vm4, %v1331_v8  ;;  %v2502_v10 = vpop.f32.mrf.mxu0  ;;  %1601 = vmatpush2.msra.mxu1 %v1103_v61 }
 0x556   :  { %vm1314_vm12 = vcmp.gt.f32.partialorder %v1291_v9, 0.0  ;;  %v1323_v12 = vmul.f32 0.01, %v1291_v9  ;;  %1602 = vmatprep.subr.mxu1 %v2635_v2 }
 0x557   :  { %v1295_v13 = vpop.f32.mrf.mxu0  ;;  %1603 = vmatpush2.msra.mxu1 %v1102_v6 }
 0x558   :  { %v1332_v15 = vsel %vm1314_vm12, %v1291_v9, %v1323_v12  ;;  %v1296_v16 = vadd.f32 %v3347_v41, %v1295_v13  ;;  %v1349_v42 = vld [vmem:[#allocation2 + $0x11] ss:$2 sm:$0xff]  ;;  %1604 = vmatprep.subr.mxu1 %v2635_v2 }
 0x559   :  { %1341 = vst.msk [vmem:[#allocation2 + $0x28] sm:$0xff] %vm345_vm4, %v1332_v15  ;;  %v2505_v17 = vpop.f32.mrf.mxu0  ;;  %1605 = vmatpush2.msra.mxu1 %v1101_v11 }
 0x55a   :  { %vm1315_vm9 = vcmp.gt.f32.partialorder %v1296_v16, 0.0  ;;  %v1324_v19 = vmul.f32 0.01, %v1296_v16  ;;  %1606 = vmatprep.subr.mxu1 %v2635_v2 }
 0x55b   :  { %v1300_v20 = vpop.f32.mrf.mxu0  ;;  %1607 = vmatpush2.msra.mxu1 %v1100_v14 }
 0x55c   :  { %v1333_v22 = vsel %vm1315_vm9, %v1296_v16, %v1324_v19  ;;  %v1301_v23 = vadd.f32 %v3347_v41, %v1300_v20  ;;  %v1347_v44 = vld [vmem:[#allocation2 + $0x20] ss:$2 sm:$0x1]  ;;  %v1350_v45 = vld [vmem:[#allocation2 + $0x21] ss:$2 sm:$0x1]  ;;  %1608 = vmatprep.subr.mxu1 %v2635_v2 }
 0x55d   :  { %1342 = vst.msk [vmem:[#allocation2 + $0x30] sm:$0xff] %vm345_vm4, %v1333_v22  ;;  %v2508_v24 = vpop.f32.mrf.mxu0  ;;  %v1353_v51 = vmax.f32 %v1347_v44, %v1350_v45  ;;  %v1099_v16 = vld [vmem:[%s3877_s12 + $0xb8] sm:$0xff]  ;;  %vm3925_vm9 = vcmask 793600  }
 0x55e   :  { %vm1316_vm2 = vcmp.gt.f32.partialorder %v1301_v23, 0.0  ;;  %v1325_v26 = vmul.f32 0.01, %v1301_v23  ;;  %1609 = vmatpush2.msra.mxu1 %v1099_v16 }
 0x55f   :  { %v1305_v27 = vpop.f32.mrf.mxu0  ;;  %1610 = vmatprep.subr.mxu1 %v2635_v2 }
 0x560   :  { %v1334_v30 = vsel %vm1316_vm2, %v1301_v23, %v1325_v26  ;;  %v1306_v31 = vadd.f32 %v3347_v41, %v1305_v27  ;;  %v1346_v41 = vld [vmem:[#allocation2 + $0x10] ss:$2 sm:$0xff]  ;;  %1611 = vmatpush2.msra.mxu1 %v1098_v18  ;;  %vm3926_vm2 = vcmask 736256  }
 0x561   :  { %1343 = vst.msk [vmem:[#allocation2 + $0x38] sm:$0xff] %vm345_vm4, %v1334_v30  ;;  %v2511_v32 = vpop.f32.mrf.mxu0  ;;  %v1352_v49 = vmax.f32 %v1346_v41, %v1349_v42  ;;  %1612 = vmatprep.subr.mxu1 %v2635_v2 }
 0x562   :  { %vm1317_vm12 = vcmp.gt.f32.partialorder %v1306_v31, 0.0  ;;  %v1326_v34 = vmul.f32 0.01, %v1306_v31  ;;  %1613 = vmatpush2.msra.mxu1 %v1097_v53 }
 0x563   :  { %v1376_v60 = vsel %vm345_vm4, %v1352_v49, 0.0  ;;  %1614 = vmatprep.subr.mxu1 %v2635_v2 }
 0x564   :  { %v1335_v36 = vsel %vm1317_vm12, %v1306_v31, %v1326_v34  ;;  %v1354_v37 = vld [vmem:[#allocation2 + $0x23] ss:$2 sm:$0xff]  ;;  %v1357_v28 = vld [vmem:[#allocation2 + $0x24] ss:$2 sm:$0xff]  ;;  %v1377_v5 = vadd.f32 %v1376_v60, %v1375_v0  ;;  %1615 = vmatpush2.msra.mxu1 %v1096_v54 }
 0x565   :  { %1344 = vst.msk [vmem:[#allocation2 + $0x40] sm:$0x3f] %vm354_vm13, %v1335_v36  ;;  %v1360_v38 = vmax.f32 %v1354_v37, %v1357_v28  ;;  %1616 = vmatprep.subr.mxu1 %v2635_v2  ;;  %vm3922_vm13 = vcmask 1042432  }
 0x567   :  { %v1366_v48 = vrot.slane %v1360_v38, 7 }
 0x569   :  { %v1374_v57 = vsel %vm388_vm14, %v1353_v51, %v1366_v48 }
 0x56a   :  { %v1378_v1 = vsel %vm345_vm4, %v1374_v57, 0.0 }
 0x56b   :  { %v1379_v9 = vadd.f32 %v1378_v1, %v1377_v5 }
 0x56c   :  { %v1355_v55 = vld [vmem:[#allocation2 + $0x33] ss:$2 sm:$0xff]  ;;  %v1356_v56 = vld [vmem:[#allocation2 + $0x43] ss:$2 sm:$0x1] }
 0x56d   :  { %v1358_v58 = vld [vmem:[#allocation2 + $0x34] ss:$2 sm:$0xff]  ;;  %v1359_v59 = vld [vmem:[#allocation2 + $0x44] ss:$2 sm:$0x1] }
 0x56e   :  { %v1361_v62 = vmax.f32 %v1355_v55, %v1358_v58  ;;  %v1362_v63 = vmax.f32 %v1356_v56, %v1359_v59  ;;  %v1095_v55 = vld [vmem:[%s3877_s12 + $0x98] sm:$0xff]  ;;  %v1094_v56 = vld [vmem:[%s3877_s12 + $0x90] sm:$0xff]  ;;  %v1093_v58 = vld [vmem:[%s3877_s12 + $0x88] sm:$0xff] }
 0x56f   :  { %1617 = vmatpush2.msra.mxu1 %v1095_v55  ;;  %v1092_v59 = vld [vmem:[%s3877_s12 + $0x80] sm:$0xff]  ;;  %s3921_s12 = smov 45  }
 0x570   :  { %v1367_v3 = vrot.slane %v1361_v62, 7  ;;  %v1369_v4 = vrot.slane %v1362_v63, 7  ;;  %1618 = vmatprep.subr.mxu1 %v2635_v2 }
 0x571   :  { %1619 = vmatpush2.msra.mxu1 %v1094_v56 }
 0x572   :  { %v1368_v7 = vsel %vm388_vm14, %v1366_v48, %v1367_v3  ;;  %v1370_v8 = vsel %vm388_vm14, %v1367_v3, %v1369_v4  ;;  %1620 = vmatprep.subr.mxu1 %v2635_v2 }
 0x573   :  { %v1380_v10 = vsel %vm345_vm4, %v1368_v7, 0.0  ;;  %v1382_v13 = vsel %vm405_vm15, %v1370_v8, 0.0  ;;  %1621 = vmatpush2.msra.mxu1 %v1093_v58 }
 0x574   :  { %v1381_v12 = vadd.f32 %v1380_v10, %v1379_v9  ;;  %1622 = vmatprep.subr.mxu1 %v2635_v2 }
 0x575   :  { %1623 = vmatpush2.msra.mxu1 %v1092_v59 }
 0x576   :  { %v1383_v15 = vadd.f32 %v1382_v13, %v1381_v12  ;;  %2512 = vmatprep.subr.mxu1 %v2635_v2 }
 0x578   :  { %v1384_v17 = vrot.slane %v1383_v15, 4 }
 0x57a   :  { %v1385_v19 = vadd.f32 %v1384_v17, %v1383_v15 }
 0x57c   :  { %v1386_v20 = vrot.slane %v1385_v19, 2 }
 0x57e   :  { %v1387_v21 = vadd.f32 %v1386_v20, %v1385_v19 }
 0x580   :  { %v1388_v22 = vrot.slane %v1387_v21, 1 }
 0x582   :  { %v1389_v23 = vadd.f32 %v1388_v22, %v1387_v21 }
 0x584   :  { %v1390_v24 = vmul.f32 0.029411765, %v1389_v23 }
 0x586   :  { %v1391_v25 = vsub.f32 %v1351_v52, %v1390_v24  ;;  %v1392_v26 = vsub.f32 %v1352_v49, %v1390_v24  ;;  %v1393_v27 = vsub.f32 %v1374_v57, %v1390_v24  ;;  %v1394_v29 = vsub.f32 %v1368_v7, %v1390_v24 }
 0x587   :  { %v3468_v30 = vsub.f32 %v1370_v8, %v1390_v24 }
 0x588   :  { %v1396_v31 = vmul.f32 %v1391_v25, %v1391_v25  ;;  %v1397_v32 = vmul.f32 %v1392_v26, %v1392_v26  ;;  %v1398_v33 = vmul.f32 %v1393_v27, %v1393_v27  ;;  %v1399_v34 = vmul.f32 %v1394_v29, %v1394_v29 }
 0x589   :  { %v1400_v28 = vmul.f32 %v3468_v30, %v3468_v30 }
 0x58a   :  { %v1401_v35 = vsel %vm345_vm4, %v1396_v31, 0.0  ;;  %v1402_v36 = vsel %vm345_vm4, %v1397_v32, 0.0  ;;  %v1404_v38 = vsel %vm345_vm4, %v1398_v33, 0.0  ;;  %v1406_v41 = vsel %vm345_vm4, %v1399_v34, 0.0 }
 0x58b   :  { %v1403_v37 = vadd.f32 %v1402_v36, %v1401_v35  ;;  %v1408_v43 = vsel %vm405_vm15, %v1400_v28, 0.0 }
 0x58d   :  { %v1405_v40 = vadd.f32 %v1404_v38, %v1403_v37 }
 0x58f   :  { %v1407_v42 = vadd.f32 %v1406_v41, %v1405_v40 }
 0x591   :  { %v1409_v44 = vadd.f32 %v1408_v43, %v1407_v42 }
 0x593   :  { %v1410_v45 = vrot.slane %v1409_v44, 4 }
 0x595   :  { %v1411_v46 = vadd.f32 %v1410_v45, %v1409_v44 }
 0x597   :  { %v1412_v47 = vrot.slane %v1411_v46, 2 }
 0x599   :  { %v1413_v48 = vadd.f32 %v1412_v47, %v1411_v46 }
 0x59b   :  { %v1414_v49 = vrot.slane %v1413_v48, 1 }
 0x59d   :  { %v1415_v50 = vadd.f32 %v1414_v49, %v1413_v48 }
 0x59f   :  { %v1416_v51 = vmul.f32 0.029411765, %v1415_v50 }
 0x5a1   :  { %v1417_v52 = vadd.f32 1e-05, %v1416_v51 }
 0x5a3   :  { %2599 = vrsqrt.f32 %v1417_v52 }
 0x5b0   :  { %v2600_v57 = vpop.eup %2599 }
 0x5b1   :  { %v3499_v60 = vmul.f32 %v2600_v57, %v1394_v29  ;;  %v3501_v62 = vmul.f32 %v2600_v57, %v1391_v25  ;;  %v1420_v63 = vmul.f32 %v2600_v57, %v1392_v26  ;;  %v1421_v0 = vmul.f32 %v2600_v57, %v1393_v27 }
 0x5b2   :  { %v1423_v27 = vmul.f32 %v2600_v57, %v3468_v30 }
 0x5b3   :  { %1515 = vrot.lane.b32.xlu0 %v3499_v60, %s2637_s2  ;;  %v1449_v1 = vrot.slane %v3499_v60, 6  ;;  %v1444_v61 = vrot.slane %v3501_v62, 2  ;;  %v1445_v3 = vrot.slane %v1420_v63, 2  ;;  %v1453_v4 = vrot.slane %v3501_v62, 3 }
 0x5b4   :  { %v1454_v5 = vrot.slane %v1420_v63, 3  ;;  %v1435_v6 = vrot.slane %v3501_v62, 1  ;;  %v1436_v7 = vrot.slane %v1420_v63, 1  ;;  %v1439_v8 = vrot.slane %v1421_v0, 5 }
 0x5b5   :  { %1491 = vrot.lane.b32.xlu1 %v1449_v1, %s2638_s26  ;;  %v1446_v9 = vsel %vm204_vm0, %v1444_v61, %v1445_v3  ;;  %v1465_v13 = vrot.slane %v3501_v62, 4  ;;  %v1466_v14 = vrot.slane %v1420_v63, 4  ;;  %v1426_v15 = vrot.slane %v1421_v0, 4 }
 0x5b6   :  { %v1437_v10 = vsel %vm462_vm5, %v1435_v6, %v1436_v7  ;;  %v1443_v11 = vsel %vm458_vm3, %v1436_v7, %v1439_v8  ;;  %v1455_v12 = vsel %vm458_vm3, %v1453_v4, %v1454_v5  ;;  %v1427_v17 = vrot.slane %v3499_v60, 4  ;;  %v1121_v7 = vld [vmem:[%s3879_s14 + $0x78] sm:$0xff] }
 0x5b7   :  { %1485 = vrot.lane.b32.xlu0 %v1446_v9, %s2638_s26  ;;  %v2578_v16 = vpack.i.bf16 %v1443_v11, %v1437_v10  ;;  %v1448_v18 = vrot.slane %v1421_v0, 6  ;;  %v1432_v19 = vsel %vm458_vm3, %v1420_v63, %v1426_v15  ;;  %v1467_v21 = vsel %vm3906_vm6, %v1465_v13, %v1466_v14  ;;  %v1120_v9 = vld [vmem:[%s3879_s14 + $0x70] sm:$0xff]  ;;  %v1135_v10 = vld [vmem:[%s3879_s14 + $0xe8] sm:$0xff]  ;;  %v1118_v13 = vld [vmem:[%s3879_s14 + $0x60] sm:$0xff] }
 0x5b8   :  { %v1428_v20 = vsel %vm3906_vm6, %v1426_v15, %v1427_v17  ;;  %v1458_v22 = vrot.slane %v1421_v0, 7  ;;  %v1459_v24 = vrot.slane %v3499_v60, 7  ;;  %v1468_v29 = vsel %vm3906_vm6, %v1466_v14, %v1426_v15  ;;  %v1119_v11 = vld [vmem:[%s3879_s14 + $0x68] sm:$0xff]  ;;  %v1133_v14 = vld [vmem:[%s3879_s14 + $0xd8] sm:$0xff] }
 0x5b9   :  { %1498 = vrot.lane.b32.xlu1 %v1455_v12, %s2640_s3  ;;  %v1452_v23 = vsel %vm458_vm3, %v1445_v3, %v1448_v18  ;;  %v1450_v31 = vsel %vm477_vm7, %v1448_v18, %v1449_v1  ;;  %v1440_v32 = vrot.slane %v3499_v60, 5  ;;  %v1470_v33 = vsel %vm458_vm3, %v1468_v29, %v1421_v0  ;;  %v1137_v60 = vld [vmem:[%s3879_s14 + $0xf8] sm:$0xff]  ;;  %v1134_v12 = vld [vmem:[%s3879_s14 + $0xe0] sm:$0xff]  ;;  %v1131_v18 = vld [vmem:[%s3879_s14 + $0xc8] sm:$0xff] }
 0x5ba   :  { %v1464_v25 = vsel %vm458_vm3, %v1454_v5, %v1458_v22  ;;  %v1460_v26 = vsel %vm388_vm14, %v1458_v22, %v1459_v24  ;;  %v1461_v34 = vrot.slane %v1423_v27, 7  ;;  %vm3923_vm5 = vcmask 56320   ;;  %2386 = vmatprep.subr.mxu0 %v1137_v60  ;;  %v1117_v15 = vld [vmem:[%s3879_s14 + $0x58] sm:$0xff]  ;;  %v1111_v29 = vld [vmem:[%s3879_s14 + $0x28] sm:$0xff] }
 0x5bb   :  { %2579 = vrot.lane.b32.xlu0 %v2578_v16, %s3921_s12  ;;  %v1441_v35 = vsel %vm3922_vm13, %v1439_v8, %v1440_v32  ;;  %vm3924_vm7 = vcmask 424960   ;;  %vm3927_vm12 = vmmov %vm3923_vm5  ;;  %v1136_v8 = vld [vmem:[%s3879_s14 + $0xf0] sm:$0xff]  ;;  %2387 = vmatpush3.msra.mxu0 %v1121_v7  ;;  %v1129_v22 = vld [vmem:[%s3879_s14 + $0xb8] sm:$0xff] }
 0x5bc   :  { %v1462_v30 = vsel %vm388_vm14, %v1459_v24, %v1461_v34  ;;  %vm3928_vm13 = vmmov %vm3923_vm5  ;;  %2388 = vmatprep.subr.mxu0 %v1136_v8  ;;  %v1132_v16 = vld [vmem:[%s3879_s14 + $0xd0] sm:$0xff] }
 0x5bd   :  { %1511 = vrot.lane.b32.xlu1 %v1467_v21, %s2637_s2  ;;  %2389 = vmatpush3.msra.mxu0 %v1120_v9  ;;  %v1114_v21 = vld [vmem:[%s3879_s14 + $0x40] sm:$0xff]  ;;  %v1128_v24 = vld [vmem:[%s3879_s14 + $0xb0] sm:$0xff] }
 0x5be   :  { %2390 = vmatprep.subr.mxu0 %v1135_v10 }
 0x5bf   :  { %1487 = vrot.lane.b32.xlu0 %v1452_v23, %s2638_s26  ;;  %2391 = vmatpush3.msra.mxu0 %v1119_v11  ;;  %v1113_v23 = vld [vmem:[%s3879_s14 + $0x38] sm:$0xff] }
 0x5c0   :  { %2392 = vmatprep.subr.mxu0 %v1134_v12 }
 0x5c1   :  { %1500 = vrot.lane.b32.xlu1 %v1464_v25, %s2640_s3  ;;  %2393 = vmatpush3.msra.mxu0 %v1118_v13  ;;  %v1112_v25 = vld [vmem:[%s3879_s14 + $0x30] sm:$0xff] }
 0x5c2   :  { %2394 = vmatprep.subr.mxu0 %v1133_v14 }
 0x5c3   :  { %1502 = vrot.lane.b32.xlu0 %v1460_v26, %s2640_s3  ;;  %2395 = vmatpush3.msra.mxu0 %v1117_v15  ;;  %v1127_v26 = vld [vmem:[%s3879_s14 + $0xa8] sm:$0xff] }
 0x5c4   :  { %2396 = vmatprep.subr.mxu0 %v1132_v16 }
 0x5c5   :  { %1489 = vrot.lane.b32.xlu1 %v1450_v31, %s2638_s26  ;;  %v1126_v31 = vld [vmem:[%s3879_s14 + $0xa0] sm:$0xff]  ;;  %s3937_s26 = smov 69  }
 0x5c7   :  { %1513 = vrot.lane.b32.xlu0 %v1470_v33, %s2637_s2  ;;  %v1110_v33 = vld [vmem:[%s3879_s14 + $0x20] sm:$0xff] }
 0x5c9   :  { %1476 = vrot.lane.b32.xlu1 %v1441_v35, %s3921_s12 }
 0x5cb   :  { %1504 = vrot.lane.b32.xlu0 %v1462_v30, %s2640_s3 }
 0x5cd   :  { %1478 = vrot.lane.b32.xlu1 %v1440_v32, %s3921_s12 }
 0x5cf   :  { %1517 = vrot.lane.b32.xlu0 %v1423_v27, %s2637_s2  ;;  %v2307_v27 = vld [vmem:[%s3878_s13] ss:$0 sm:$0xff] }
 0x625   :  { %v1516_v36 = vpop.permute.xlu0 %1515 }
 0x627   :  { %v1492_v37 = vpop.permute.xlu1 %1491 }
 0x629   :  { %v1486_v28 = vpop.permute.xlu0 %1485 }
 0x62b   :  { %v1499_v38 = vpop.permute.xlu1 %1498 }
 0x62c   :  { %v1531_v42 = vsel %vm3923_vm5, %v1486_v28, %v1499_v38  ;;  %vm3929_vm5 = vmmov %vm3924_vm7 }
 0x62d   :  { %v2580_v40 = vpop.permute.xlu0 %2579 }
 0x62e   :  { %v2581_v41 = vunpack.i.l.bf16 %v2580_v40  ;;  %v2582_v49 = vunpack.i.h.bf16 %v2580_v40 }
 0x62f   :  { %v1512_v43 = vpop.permute.xlu1 %1511 }
 0x630   :  { %v1523_v44 = vsel %vm345_vm4, %v3501_v62, %v2581_v41  ;;  %v1535_v45 = vsel %vm3924_vm7, %v1531_v42, %v1512_v43  ;;  %v1524_v52 = vsel %vm345_vm4, %v1432_v19, %v2582_v49  ;;  %vm3930_vm7 = vmmov %vm3925_vm9  ;;  %v1115_v19 = vld [vmem:[%s3879_s14 + $0x48] sm:$0xff] }
 0x631   :  { %2309 = vmatprep.mubr.msk.f32.mxu1 %vm3925_vm9, %v1535_v45  ;;  %v1488_v46 = vpop.permute.xlu0 %1487  ;;  %v1527_v47 = vsel %vm3926_vm2, %v1523_v44, %v1486_v28  ;;  %vm3931_vm9 = vmmov %vm3926_vm2 }
 0x632   :  { %1625 = vmatmul.mubr.f32.vlgmr.msra.gmra.mxu1 %v1527_v47  ;;  %v1528_v58 = vsel %vm3931_vm9, %v1524_v52, %v1488_v46  ;;  %vm3932_vm2 = vmmov %vm3929_vm5 }
 0x633   :  { %v1501_v48 = vpop.permute.xlu1 %1500  ;;  %vm3933_vm6 = vmmov %vm3930_vm7 }
 0x634   :  { %v1532_v53 = vsel %vm3927_vm12, %v1488_v46, %v1501_v48  ;;  %vm3934_vm12 = vmmov %vm3931_vm9 }
 0x635   :  { %v1503_v50 = vpop.permute.xlu0 %1502 }
 0x637   :  { %v1490_v51 = vpop.permute.xlu1 %1489 }
 0x638   :  { %v1533_v54 = vsel %vm3928_vm13, %v1490_v51, %v1503_v50 }
 0x639   :  { %v1514_v55 = vpop.permute.xlu0 %1513  ;;  %v1537_v62 = vsel %vm3932_vm2, %v1533_v54, %v1516_v36 }
 0x63a   :  { %v1536_v56 = vsel %vm3929_vm5, %v1532_v53, %v1514_v55  ;;  %vm3935_vm5 = vmmov %vm3932_vm2 }
 0x63b   :  { %v1477_v57 = vpop.permute.xlu1 %1476  ;;  %2310 = vmatprep.mubr.msk.f32.mxu1 %vm3930_vm7, %v1536_v56  ;;  %vm3936_vm7 = vmmov %vm3933_vm6 }
 0x63c   :  { %v1525_v59 = vsel %vm345_vm4, %v1428_v20, %v1477_v57  ;;  %1630 = vmatmul.mubr.f32.gmra.mxu1 %v1528_v58  ;;  %v1130_v20 = vld [vmem:[%s3879_s14 + $0xc0] sm:$0xff] }
 0x63d   :  { %v1505_v63 = vpop.permute.xlu0 %1504  ;;  %2311 = vmatprep.mubr.msk.f32.mxu1 %vm3933_vm6, %v1537_v62  ;;  %v1529_v1 = vsel %vm3934_vm12, %v1525_v59, %v1490_v51 }
 0x63e   :  { %v1534_v3 = vsel %vm3928_vm13, %v1492_v37, %v1505_v63 }
 0x63f   :  { %v1479_v0 = vpop.permute.xlu1 %1478 }
 0x640   :  { %v1526_v61 = vsel %vm345_vm4, %v1427_v17, %v1479_v0  ;;  %1635 = vmatmul.mubr.f32.gmra.mxu1 %v1529_v1  ;;  %v1116_v17 = vld [vmem:[%s3879_s14 + $0x50] sm:$0xff] }
 0x641   :  { %v1518_v4 = vpop.permute.xlu0 %1517  ;;  %v1530_v6 = vsel %vm3931_vm9, %v1526_v61, %v1492_v37  ;;  %2397 = vmatpush3.msra.mxu0 %v1116_v17  ;;  %vm3943_vm9 = vcmask 31744  }
 0x642   :  { %v1538_v5 = vsel %vm3935_vm5, %v1534_v3, %v1518_v4  ;;  %2398 = vmatprep.subr.mxu0 %v1131_v18  ;;  %vm3940_vm5 = vcmask 547840  }
 0x643   :  { %2312 = vmatprep.mubr.msk.f32.mxu1 %vm3936_vm7, %v1538_v5  ;;  %2399 = vmatpush3.msra.mxu0 %v1115_v19  ;;  %vm3941_vm7 = vmmov %vm3940_vm5 }
 0x644   :  { %1640 = vmatmul.mubr.f32.gmra.mxu1 %v1530_v6  ;;  %2400 = vmatprep.subr.mxu0 %v1130_v20 }
 0x645   :  { %2524 = vmatprep.mubr.msk.f32.mxu1 %vm2636_vm1, %v2635_v2  ;;  %2401 = vmatpush3.msra.mxu0 %v1114_v21 }
 0x646   :  { %2402 = vmatprep.subr.mxu0 %v1129_v22  ;;  %v1125_v22 = vld [vmem:[%s3879_s14 + $0x98] sm:$0xff] }
 0x647   :  { %2403 = vmatpush3.msra.mxu0 %v1113_v23  ;;  %v1109_v23 = vld [vmem:[%s3879_s14 + $0x18] sm:$0xff] }
 0x648   :  { %2404 = vmatprep.subr.mxu0 %v1128_v24  ;;  %v1124_v24 = vld [vmem:[%s3879_s14 + $0x90] sm:$0xff] }
 0x649   :  { %2405 = vmatpush3.msra.mxu0 %v1112_v25  ;;  %v1108_v25 = vld [vmem:[%s3879_s14 + $0x10] sm:$0xff] }
 0x64a   :  { %2406 = vmatprep.subr.mxu0 %v1127_v26  ;;  %v1123_v26 = vld [vmem:[%s3879_s14 + $0x88] sm:$0xff] }
 0x64b   :  { %2407 = vmatpush3.msra.mxu0 %v1111_v29  ;;  %v1122_v29 = vld [vmem:[%s3879_s14 + $0x80] sm:$0xff] }
 0x64c   :  { %2408 = vmatprep.subr.mxu0 %v1126_v31 }
 0x64d   :  { %2409 = vmatpush3.msra.mxu0 %v1110_v33 }
 0x64e   :  { %2410 = vmatprep.subr.mxu0 %v1125_v22  ;;  %v1138_v22 = vld [vmem:[%s3879_s14 + $0x100] sm:$0xff] }
 0x64f   :  { %2411 = vmatpush3.msra.mxu0 %v1109_v23 }
 0x650   :  { %2412 = vmatprep.subr.mxu0 %v1124_v24 }
 0x651   :  { %2413 = vmatpush3.msra.mxu0 %v1108_v25  ;;  %v1154_v25 = vld [vmem:[%s3879_s14 + $0x180] sm:$0x3f] }
 0x652   :  { %2414 = vmatprep.subr.mxu0 %v1123_v26 }
 0x6f2   :  { %v1626_v32 = vpop.f32.mrf.mxu1 }
 0x6f3   :  { %v1627_v34 = vadd.f32 %v2307_v27, %v1626_v32  ;;  %v1106_v32 = vld [vmem:[%s3879_s14] sm:$0xff] }
 0x6f4   :  { %v1628_v35 = vpop.f32.mrf.mxu1 }
 0x6f5   :  { %vm1645_vm6 = vcmp.gt.f32.partialorder %v1627_v34, 0.0  ;;  %v1649_v30 = vmul.f32 0.01, %v1627_v34 }
 0x6f7   :  { %v1653_v36 = vsel %vm1645_vm6, %v1627_v34, %v1649_v30  ;;  %vm3944_vm6 = vcmask 564224  }
 0x6f8   :  { %1657 = vst.msk [vmem:[#allocation3] sm:$0xff] %vm691_vm11, %v1653_v36 }
 0x6fc   :  { %v1631_v37 = vpop.f32.mrf.mxu1 }
 0x6fd   :  { %v1632_v28 = vadd.f32 %v2307_v27, %v1631_v37 }
 0x6fe   :  { %v1633_v38 = vpop.f32.mrf.mxu1 }
 0x6ff   :  { %vm1646_vm2 = vcmp.gt.f32.partialorder %v1632_v28, 0.0  ;;  %v1650_v40 = vmul.f32 0.01, %v1632_v28 }
 0x700   :  { %v1636_v41 = vpop.f32.mrf.mxu1 }
 0x701   :  { %v1654_v42 = vsel %vm1646_vm2, %v1632_v28, %v1650_v40  ;;  %v1637_v43 = vadd.f32 %v2307_v27, %v1636_v41  ;;  %vm3945_vm2 = vmmov %vm3943_vm9 }
 0x702   :  { %1658 = vst.msk [vmem:[#allocation3 + $0x8] sm:$0xff] %vm691_vm11, %v1654_v42  ;;  %v1638_v44 = vpop.f32.mrf.mxu1 }
 0x703   :  { %vm1647_vm12 = vcmp.gt.f32.partialorder %v1637_v43, 0.0  ;;  %v1651_v45 = vmul.f32 0.01, %v1637_v43 }
 0x704   :  { %v1641_v46 = vpop.f32.mrf.mxu1 }
 0x705   :  { %v1655_v47 = vsel %vm1647_vm12, %v1637_v43, %v1651_v45  ;;  %v1642_v48 = vadd.f32 %v2307_v27, %v1641_v46  ;;  %v1107_v27 = vld [vmem:[%s3879_s14 + $0x8] sm:$0xff]  ;;  %vm3946_vm12 = vmmov %vm3944_vm6 }
 0x706   :  { %1659 = vst.msk [vmem:[#allocation3 + $0x10] sm:$0xff] %vm691_vm11, %v1655_v47  ;;  %v1643_v49 = vpop.f32.mrf.mxu1  ;;  %2415 = vmatpush3.msra.mxu0 %v1107_v27  ;;  %v1161_v27 = vld [vmem:[%s3881_s16 + $0x28] sm:$0x1f] }
 0x707   :  { %vm1648_vm13 = vcmp.gt.f32.partialorder %v1642_v48, 0.0  ;;  %v1652_v50 = vmul.f32 0.01, %v1642_v48  ;;  %2416 = vmatprep.subr.mxu0 %v1122_v29  ;;  %2513 = vmatpush3.msk.msra.mxu1 %vm458_vm3, %v1161_v27  ;;  %v1160_v29 = vld [vmem:[%s3881_s16 + $0x20] sm:$0xff]  ;;  %vm2111_vm3 = vcmask 517120  }
 0x708   :  { %2417 = vmatpush3.msra.mxu0 %v1106_v32  ;;  %2514 = vmatprep.subr.mxu1 %v2635_v2  ;;  %v1158_v32 = vld [vmem:[%s3881_s16 + $0x10] sm:$0xff] }
 0x709   :  { %v1656_v51 = vsel %vm1648_vm13, %v1642_v48, %v1652_v50  ;;  %v1661_v52 = vld [vmem:[#allocation3] ss:$2 sm:$0x3f]  ;;  %v1662_v53 = vld [vmem:[#allocation3 + $0x1] ss:$2 sm:$0x3f]  ;;  %1843 = vmatprep.subr.mxu0 %v2635_v2  ;;  %2515 = vmatpush3.msra.mxu1 %v1160_v29 }
 0x70a   :  { %1660 = vst.msk [vmem:[#allocation3 + $0x18] sm:$0x3] %vm695_vm8, %v1656_v51  ;;  %v1663_v57 = vmax.f32 %v1661_v52, %v1662_v53  ;;  %vm3938_vm8 = vcmask 15360   ;;  %2516 = vmatprep.subr.mxu1 %v2635_v2  ;;  %vm2148_vm13 = vcmask 523264  }
 0x70d   :  { %v1664_v54 = vld [vmem:[#allocation3 + $0xd] ss:$2 sm:$0x3f] }
 0x711   :  { %v1665_v55 = vld [vmem:[#allocation3 + $0xe] ss:$2 sm:$0x3f] }
 0x712   :  { %v1666_v56 = vmax.f32 %v1664_v54, %v1665_v55 }
 0x714   :  { %v1668_v58 = vrot.slane %v1666_v56, 2 }
 0x716   :  { %v1670_v59 = vsel %vm204_vm0, %v1663_v57, %v1668_v58  ;;  %v1672_v62 = vsel %vm711_vm10, %v1668_v58, 0.0 }
 0x717   :  { %v1671_v63 = vsel %vm691_vm11, %v1670_v59, 0.0 }
 0x718   :  { %v1673_v0 = vadd.f32 %v1672_v62, %v1671_v63  ;;  %v1153_v62 = vld [vmem:[%s3879_s14 + $0x178] sm:$0xff] }
 0x71a   :  { %v1674_v1 = vrot.slane %v1673_v0, 4 }
 0x71c   :  { %v1675_v61 = vadd.f32 %v1674_v1, %v1673_v0 }
 0x71e   :  { %v1676_v3 = vrot.slane %v1675_v61, 2 }
 0x720   :  { %v1677_v4 = vadd.f32 %v1676_v3, %v1675_v61  ;;  %v1152_v61 = vld [vmem:[%s3879_s14 + $0x170] sm:$0xff] }
 0x722   :  { %v1678_v5 = vrot.slane %v1677_v4, 1 }
 0x724   :  { %v1679_v6 = vadd.f32 %v1678_v5, %v1677_v4  ;;  %v1151_v5 = vld [vmem:[%s3879_s14 + $0x168] sm:$0xff] }
 0x726   :  { %v1680_v60 = vmul.f32 0.083333336, %v1679_v6  ;;  %v1150_v6 = vld [vmem:[%s3879_s14 + $0x160] sm:$0xff] }
 0x728   :  { %v1681_v7 = vsub.f32 %v1670_v59, %v1680_v60  ;;  %v1682_v8 = vsub.f32 %v1668_v58, %v1680_v60  ;;  %v1149_v60 = vld [vmem:[%s3879_s14 + $0x158] sm:$0xff] }
 0x72a   :  { %v1683_v9 = vmul.f32 %v1681_v7, %v1681_v7  ;;  %v1684_v10 = vmul.f32 %v1682_v8, %v1682_v8 }
 0x72c   :  { %v1685_v11 = vsel %vm691_vm11, %v1683_v9, 0.0  ;;  %v1686_v12 = vsel %vm711_vm10, %v1684_v10, 0.0  ;;  %vm3939_vm10 = vmmov %vm3938_vm8  ;;  %v1146_v9 = vld [vmem:[%s3879_s14 + $0x140] sm:$0xff]  ;;  %v1145_v10 = vld [vmem:[%s3879_s14 + $0x138] sm:$0xff] }
 0x72d   :  { %v1687_v13 = vadd.f32 %v1686_v12, %v1685_v11  ;;  %v1144_v11 = vld [vmem:[%s3879_s14 + $0x130] sm:$0xff]  ;;  %v1143_v12 = vld [vmem:[%s3879_s14 + $0x128] sm:$0xff] }
 0x72f   :  { %v1688_v14 = vrot.slane %v1687_v13, 4 }
 0x731   :  { %v1689_v15 = vadd.f32 %v1688_v14, %v1687_v13  ;;  %v1142_v14 = vld [vmem:[%s3879_s14 + $0x120] sm:$0xff] }
 0x733   :  { %v1690_v16 = vrot.slane %v1689_v15, 2 }
 0x735   :  { %v1691_v17 = vadd.f32 %v1690_v16, %v1689_v15  ;;  %v1141_v15 = vld [vmem:[%s3879_s14 + $0x118] sm:$0xff] }
 0x737   :  { %v1692_v18 = vrot.slane %v1691_v17, 1 }
 0x739   :  { %v1693_v19 = vadd.f32 %v1692_v18, %v1691_v17  ;;  %v1140_v18 = vld [vmem:[%s3879_s14 + $0x110] sm:$0xff] }
 0x73b   :  { %v1694_v20 = vmul.f32 0.083333336, %v1693_v19 }
 0x73d   :  { %v1695_v21 = vadd.f32 1e-05, %v1694_v20  ;;  %v1139_v20 = vld [vmem:[%s3879_s14 + $0x108] sm:$0xff] }
 0x73f   :  { %2601 = vrsqrt.f32 %v1695_v21 }
 0x74c   :  { %v2602_v31 = vpop.eup %2601 }
 0x74d   :  { %v1697_v33 = vmul.f32 %v2602_v31, %v1681_v7  ;;  %v1698_v34 = vmul.f32 %v2602_v31, %v1682_v8  ;;  %v1148_v7 = vld [vmem:[%s3879_s14 + $0x150] sm:$0xff]  ;;  %v1147_v8 = vld [vmem:[%s3879_s14 + $0x148] sm:$0xff]  ;;  %v1159_v31 = vld [vmem:[%s3881_s16 + $0x18] sm:$0xff] }
 0x74e   :  { %2517 = vmatpush3.msra.mxu1 %v1159_v31 }
 0x74f   :  { %v1700_v35 = vrot.slane %v1697_v33, 1  ;;  %v1704_v30 = vrot.slane %v1697_v33, 2  ;;  %v1726_v36 = vrot.slane %v1698_v34, 2  ;;  %v1730_v28 = vrot.slane %v1698_v34, 3  ;;  %2518 = vmatprep.subr.mxu1 %v2635_v2 }
 0x750   :  { %v1712_v38 = vrot.slane %v1697_v33, 4  ;;  %v1734_v40 = vrot.slane %v1698_v34, 4  ;;  %v1708_v41 = vrot.slane %v1697_v33, 3  ;;  %v1738_v43 = vrot.slane %v1698_v34, 5  ;;  %2519 = vmatpush3.msra.mxu1 %v1158_v32  ;;  %v1156_v34 = vld [vmem:[%s3881_s16] sm:$0xff] }
 0x751   :  { %1701 = vrot.lane.b32.xlu1 %v1700_v35, %s2641_s1  ;;  %v2583_v37 = vpack.i.bf16 %v1704_v30, %v1726_v36  ;;  %v1716_v44 = vrot.slane %v1697_v33, 5  ;;  %2520 = vmatprep.subr.mxu1 %v2635_v2 }
 0x752   :  { %v2588_v42 = vpack.i.bf16 %v1712_v38, %v1734_v40 }
 0x753   :  { %2584 = vrot.lane.b32.xlu0 %v2583_v37, %s2642_s5  ;;  %v2313_v37 = vld [vmem:[%s3880_s15] ss:$0 sm:$0xff] }
 0x755   :  { %1731 = vrot.lane.b32.xlu1 %v1730_v28, %s2643_s24 }
 0x757   :  { %1709 = vrot.lane.b32.xlu0 %v1708_v41, %s2643_s24 }
 0x759   :  { %2589 = vrot.lane.b32.xlu1 %v2588_v42, %s2644_s6 }
 0x75b   :  { %1739 = vrot.lane.b32.xlu0 %v1738_v43, %s3937_s26 }
 0x75d   :  { %1717 = vrot.lane.b32.xlu1 %v1716_v44, %s3937_s26 }
 0x7c3   :  { %v1702_v45 = vpop.permute.xlu1 %1701 }
 0x7c4   :  { %v1720_v47 = vsel %vm691_vm11, %v1697_v33, %v1702_v45  ;;  %vm3942_vm11 = vcmask 48128   ;;  %v1157_v33 = vld [vmem:[%s3881_s16 + $0x8] sm:$0xff] }
 0x7c5   :  { %v2585_v46 = vpop.permute.xlu0 %2584  ;;  %v1749_v53 = vrot.slane %v1720_v47, 5  ;;  %2521 = vmatpush3.msra.mxu1 %v1157_v33 }
 0x7c6   :  { %v2587_v48 = vunpack.i.h.bf16 %v2585_v46  ;;  %v2586_v49 = vunpack.i.l.bf16 %v2585_v46  ;;  %2522 = vmatprep.subr.mxu1 %v2635_v2 }
 0x7c7   :  { %v1732_v50 = vpop.permute.xlu1 %1731  ;;  %v1757_v0 = vsel %vm388_vm14, %v1720_v47, %v1749_v53  ;;  %2523 = vmatpush3.msra.mxu1 %v1156_v34 }
 0x7c8   :  { %v1742_v51 = vsel %vm3938_vm8, %v1702_v45, %v2586_v49  ;;  %v1721_v52 = vsel %vm3939_vm10, %v1702_v45, %v2587_v48  ;;  %2527 = vmatprep.subr.mxu1 %v2635_v2  ;;  %vm2225_vm10 = vcmask 9216  }
 0x7c9   :  { %v1743_v54 = vsel %vm3940_vm5, %v1742_v51, %v1732_v50  ;;  %v1710_v55 = vpop.permute.xlu0 %1709 }
 0x7ca   :  { %v1750_v56 = vrot.slane %v1743_v54, 5  ;;  %v1722_v57 = vsel %vm3941_vm7, %v1721_v52, %v1710_v55 }
 0x7cb   :  { %v2590_v58 = vpop.permute.xlu1 %2589 }
 0x7cc   :  { %v1758_v59 = vsel %vm388_vm14, %v1722_v57, %v1750_v56  ;;  %v2591_v13 = vunpack.i.l.bf16 %v2590_v58  ;;  %v2592_v16 = vunpack.i.h.bf16 %v2590_v58 }
 0x7cd   :  { %v1740_v63 = vpop.permute.xlu0 %1739  ;;  %1837 = vmatprep.mubr.f32.mxu0 %v1758_v59 }
 0x7ce   :  { %v1752_v1 = vrot.slane %v1740_v63, 5  ;;  %1838 = vmatmul.mubr.f32.vlgmr.msra.gmra.mxu0 %v1757_v0  ;;  %v1744_v17 = vsel %vm3943_vm9, %v1732_v50, %v2591_v13  ;;  %v1723_v21 = vsel %vm3945_vm2, %v1710_v55, %v2592_v16  ;;  %v2137_v13 = vld [vmem:[%s3885_s20 + $0x20] sm:$0xff]  ;;  %v2134_v16 = vld [vmem:[%s3885_s20 + $0x8] sm:$0xff] }
 0x7cf   :  { %1844 = vmatpush1.msra.mxu0 %v1153_v62  ;;  %v1718_v3 = vpop.permute.xlu1 %1717  ;;  %v1745_v19 = vsel %vm3944_vm6, %v1744_v17, %v1740_v63  ;;  %v2133_v17 = vld [vmem:[%s3885_s20] sm:$0xff] }
 0x7d0   :  { %1845 = vmatprep.subr.mxu0 %v2635_v2  ;;  %v1760_v4 = vsel %vm388_vm14, %v1718_v3, %v1752_v1  ;;  %v1751_v23 = vrot.slane %v1745_v19, 5  ;;  %v1724_v24 = vsel %vm3946_vm12, %v1723_v21, %v1718_v3  ;;  %v2024_v3 = vld [vmem:[%s3883_s18] sm:$0xf] }
 0x7d1   :  { %1846 = vmatpush1.msra.mxu0 %v1152_v61  ;;  %2315 = vmatprep.mubr.msk.f32.mxu0 %vm3942_vm11, %v1760_v4  ;;  %v2316_v4 = vld [vmem:[%s3882_s17] ss:$0 sm:$0xff] }
 0x7d2   :  { %1847 = vmatprep.subr.mxu0 %v2635_v2  ;;  %v1759_v26 = vsel %vm388_vm14, %v1724_v24, %v1751_v23  ;;  %vm3947_vm14 = vcmask 1043456  }
 0x7d3   :  { %1848 = vmatpush1.msra.mxu0 %v1151_v5 }
 0x7d4   :  { %1849 = vmatprep.subr.mxu0 %v2635_v2 }
 0x7d5   :  { %1850 = vmatpush1.msra.mxu0 %v1150_v6 }
 0x7d6   :  { %1851 = vmatprep.subr.mxu0 %v2635_v2 }
 0x7d7   :  { %1852 = vmatpush1.msra.mxu0 %v1149_v60 }
 0x7d8   :  { %1853 = vmatprep.subr.mxu0 %v2635_v2 }
 0x7d9   :  { %1854 = vmatpush1.msra.mxu0 %v1148_v7  ;;  %v2293_v7 = vld [vmem:[%s3874_s9] ss:$0 sm:$0xff] }
 0x7da   :  { %1855 = vmatprep.subr.mxu0 %v2635_v2 }
 0x7db   :  { %1856 = vmatpush1.msra.mxu0 %v1147_v8  ;;  %v1062_v8 = vadd.f32 %v2293_v7, %v3342_v39  ;;  %v2138_v39 = vld [vmem:[%s3885_s20 + $0x28] sm:$0xff] }
 0x7dc   :  { %1857 = vmatprep.subr.mxu0 %v2635_v2 }
 0x7dd   :  { %1858 = vmatpush1.msra.mxu0 %v1146_v9 }
 0x7de   :  { %1859 = vmatprep.subr.mxu0 %v2635_v2 }
 0x7df   :  { %1860 = vmatpush1.msra.mxu0 %v1145_v10 }
 0x7e0   :  { %1861 = vmatprep.subr.mxu0 %v2635_v2 }
 0x7e1   :  { %1862 = vmatpush1.msra.mxu0 %v1144_v11  ;;  %v2140_v11 = vld [vmem:[%s3885_s20 + $0x38] sm:$0xff] }
 0x7e2   :  { %1863 = vmatprep.subr.mxu0 %v2635_v2 }
 0x7e3   :  { %1864 = vmatpush1.msra.mxu0 %v1143_v12  ;;  %v2139_v12 = vld [vmem:[%s3885_s20 + $0x30] sm:$0xff] }
 0x7e4   :  { %1865 = vmatprep.subr.mxu0 %v2635_v2 }
 0x7e5   :  { %1866 = vmatpush1.msra.mxu0 %v1142_v14  ;;  %v2136_v14 = vld [vmem:[%s3885_s20 + $0x18] sm:$0xff] }
 0x7e6   :  { %1867 = vmatprep.subr.mxu0 %v2635_v2 }
 0x7e7   :  { %1868 = vmatpush1.msra.mxu0 %v1141_v15  ;;  %v2135_v15 = vld [vmem:[%s3885_s20 + $0x10] sm:$0xff] }
 0x7e8   :  { %1869 = vmatprep.subr.mxu0 %v2635_v2 }
 0x7e9   :  { %1870 = vmatpush1.msra.mxu0 %v1140_v18  ;;  %v2319_v18 = vld [vmem:[%s3884_s19] ss:$0 sm:$0xff] }
 0x7ea   :  { %1871 = vmatprep.subr.mxu0 %v2635_v2 }
 0x7eb   :  { %1872 = vmatpush1.msra.mxu0 %v1139_v20 }
 0x7ec   :  { %1873 = vmatprep.subr.mxu0 %v2635_v2 }
 0x7ed   :  { %1874 = vmatpush1.msra.mxu0 %v1138_v22 }
 0x7ee   :  { %1905 = vmatprep.subr.mxu0 %v2635_v2 }
 0x7ef   :  { %2314 = vmatpush2.msk.msra.mxu0 %vm204_vm0, %v1154_v25 }
 0x7f0   :  { %1908 = vmatmul.mubr.f32.vlgmr.msra.gmra.mxu0 %v1759_v26 }
 0x88e   :  { %v2418_v35 = vpop.f32.mrf.mxu0 }
 0x890   :  { %v2419_v30 = vpop.f32.mrf.mxu0 }
 0x891   :  { %v2420_v36 = vadd.f32 %v2419_v30, %v2418_v35 }
 0x893   :  { %v1840_v28 = vadd.f32 %v2420_v36, %v2313_v37 }
 0x8b0   :  { %v1909_v38 = vpop.f32.mrf.mxu0 }
 0x8b1   :  { %v1910_v40 = vadd.f32 %v1909_v38, %v1840_v28 }
 0x8b2   :  { %v1911_v41 = vpop.f32.mrf.mxu0 }
 0x8b3   :  { %vm1913_vm0 = vcmp.gt.f32.partialorder %v1910_v40, 0.0  ;;  %v1914_v42 = vmul.f32 0.01, %v1910_v40 }
 0x8b5   :  { %v1915_v43 = vsel %vm1913_vm0, %v1910_v40, %v1914_v42 }
 0x8b6   :  { %v1916_v44 = vsel %vm405_vm15, %v1915_v43, 0.0 }
 0x8b7   :  { %v1917_v45 = vrot.slane %v1916_v44, 4 }
 0x8b9   :  { %v1918_v46 = vadd.f32 %v1917_v45, %v1916_v44  ;;  %v2322_v45 = vld [vmem:[%s3886_s21] ss:$0 sm:$0xff]  ;;  %s2646_s21 = smov [#allocation4]  }
 0x8ba   :  { %s2265_s3 = sshll.u32 %s2646_s21, 4  ;;  %s2266_s3 = int_to_ptr.vmem [resolvable:$true] %s2265_s3 }
 0x8bb   :  { %v1919_v47 = vrot.slane %v1918_v46, 2  ;;  %s2613_s7 = scalar_lea.vmem %s2266_s3, 32  ;;  %p2618_p1 = scmp.lt.s32.totalorder %s2266_s3, %s2266_s3 }
 0x8bc   :  { %p2614_p0 = scmp.ne.s32.totalorder %s2266_s3, %s2613_s7  ;;  %p2619_p2 = scmp.lt.s32.totalorder %s2613_s7, %s2613_s7 }
 0x8bd   :  { %v1920_v48 = vadd.f32 %v1919_v47, %v1918_v46 }
 0x8be   :  { %p2620_p3 = por %p2619_p2, %p2618_p1 }
 0x8bf   :  { %v1921_v49 = vrot.slane %v1920_v48, 1 }
 0x8c0   :  { %p2621_p4 = pnand %p2620_p3, %p2614_p0 }
 0x8c1   :  { %v1922_v50 = vadd.f32 %v1921_v49, %v1920_v48 }
 0x8c3   :  { %v1923_v51 = vmul.f32 0.5, %v1922_v50 }
 0x8c5   :  { %v1924_v52 = vsub.f32 %v1915_v43, %v1923_v51 }
 0x8c7   :  { %v1925_v53 = vmul.f32 %v1924_v52, %v1924_v52 }
 0x8c9   :  { %v1926_v54 = vsel %vm405_vm15, %v1925_v53, 0.0  ;;  %vm3949_vm15 = vmmov %vm3945_vm2 }
 0x8ca   :  { %v1927_v55 = vrot.slane %v1926_v54, 4 }
 0x8cc   :  { %v1928_v56 = vadd.f32 %v1927_v55, %v1926_v54 }
 0x8ce   :  { %v1929_v57 = vrot.slane %v1928_v56, 2 }
 0x8d0   :  { %v1930_v58 = vadd.f32 %v1929_v57, %v1928_v56 }
 0x8d2   :  { %v1931_v59 = vrot.slane %v1930_v58, 1 }
 0x8d4   :  { %v1932_v62 = vadd.f32 %v1931_v59, %v1930_v58 }
 0x8d6   :  { %v1933_v63 = vmul.f32 0.5, %v1932_v62 }
 0x8d8   :  { %v1934_v0 = vadd.f32 1e-05, %v1933_v63 }
 0x8da   :  { %2603 = vrsqrt.f32 %v1934_v0 }
 0x8e7   :  { %v2604_v1 = vpop.eup %2603 }
 0x8e8   :  { %v1936_v61 = vmul.f32 %v2604_v1, %v1924_v52 }
 0x8ea   :  { %2525 = vmatmul.mubr.msk.f32.vlgmr.msra.gmra.mxu1 %vm345_vm4, %v1936_v61  ;;  %vm3948_vm4 = vmmov %vm3938_vm8 }
 0x8eb   :  { %2529 = vmatprep.mubr.msk.f32.mxu1 %vm2636_vm1, %v2635_v2  ;;  %2528 = vmatpush3.msk.msra.mxu1 %vm3947_vm14, %v2024_v3 }
 0x8ec   :  { %2532 = vmatprep.subr.mxu1 %v2635_v2 }
 0x9aa   :  { %v2015_v5 = vpop.f32.mrf.mxu1 }
 0x9ab   :  { %v2016_v6 = vadd.f32 %v2316_v4, %v2015_v5 }
 0x9ac   :  { %v2526_v60 = vpop.f32.mrf.mxu1 }
 0x9ad   :  { %2020 = vrot.lane.b32.xlu0 %v2016_v6, %s2642_s5 }
 0xa1f   :  { %v2021_v9 = vpop.permute.xlu0 %2020 }
 0xa20   :  { %v2023_v10 = vsel %vm3948_vm4, %v1062_v8, %v2021_v9 }
 0xa21   :  { %2530 = vmatmul.mubr.msk.f32.vlgmr.msra.gmra.mxu1 %vm3949_vm15, %v2023_v10 }
 0xa22   :  { %2548 = vmatprep.mubr.msk.f32.mxu1 %vm2636_vm1, %v2635_v2  ;;  %2533 = vmatpush3.msra.mxu1 %v2140_v11 }
 0xa23   :  { %2534 = vmatprep.subr.mxu1 %v2635_v2 }
 0xa24   :  { %2535 = vmatpush3.msra.mxu1 %v2139_v12 }
 0xa25   :  { %2536 = vmatprep.subr.mxu1 %v2635_v2 }
 0xa26   :  { %2537 = vmatpush3.msra.mxu1 %v2138_v39 }
 0xa27   :  { %2538 = vmatprep.subr.mxu1 %v2635_v2 }
 0xa28   :  { %2539 = vmatpush3.msra.mxu1 %v2137_v13 }
 0xa29   :  { %2540 = vmatprep.subr.mxu1 %v2635_v2 }
 0xa2a   :  { %2541 = vmatpush3.msra.mxu1 %v2136_v14 }
 0xa2b   :  { %2542 = vmatprep.subr.mxu1 %v2635_v2 }
 0xa2c   :  { %2543 = vmatpush3.msra.mxu1 %v2135_v15 }
 0xa2d   :  { %2544 = vmatprep.subr.mxu1 %v2635_v2 }
 0xa2e   :  { %2545 = vmatpush3.msra.mxu1 %v2134_v16 }
 0xa2f   :  { %2546 = vmatprep.subr.mxu1 %v2635_v2 }
 0xa30   :  { %2547 = vmatpush3.msra.mxu1 %v2133_v17 }
 0xae1   :  { %v2104_v19 = vpop.f32.mrf.mxu1 }
 0xae2   :  { %v2105_v20 = vadd.f32 %v2319_v18, %v2104_v19 }
 0xae3   :  { %v2531_v21 = vpop.f32.mrf.mxu1 }
 0xae4   :  { %vm2108_vm1 = vcmp.gt.f32.partialorder %v2105_v20, 0.0  ;;  %v2109_v22 = vmul.f32 0.01, %v2105_v20 }
 0xae6   :  { %v2110_v23 = vsel %vm2108_vm1, %v2105_v20, %v2109_v22 }
 0xae7   :  { %v2112_v24 = vsel %vm2111_vm3, %v2110_v23, 0.0 }
 0xae8   :  { %v2113_v25 = vrot.slane %v2112_v24, 4 }
 0xaea   :  { %v2114_v26 = vadd.f32 %v2113_v25, %v2112_v24 }
 0xaec   :  { %v2115_v27 = vrot.slane %v2114_v26, 2 }
 0xaee   :  { %v2116_v29 = vadd.f32 %v2115_v27, %v2114_v26 }
 0xaf0   :  { %v2117_v31 = vrot.slane %v2116_v29, 1 }
 0xaf2   :  { %v2118_v32 = vadd.f32 %v2117_v31, %v2116_v29 }
 0xaf4   :  { %v2119_v2 = vmul.f32 0.5, %v2118_v32 }
 0xaf6   :  { %v2120_v33 = vsub.f32 %v2110_v23, %v2119_v2 }
 0xaf8   :  { %v2121_v34 = vmul.f32 %v2120_v33, %v2120_v33 }
 0xafa   :  { %v2122_v35 = vsel %vm2111_vm3, %v2121_v34, 0.0 }
 0xafb   :  { %v2123_v30 = vrot.slane %v2122_v35, 4 }
 0xafd   :  { %v2124_v36 = vadd.f32 %v2123_v30, %v2122_v35 }
 0xaff   :  { %v2125_v37 = vrot.slane %v2124_v36, 2 }
 0xb01   :  { %v2126_v28 = vadd.f32 %v2125_v37, %v2124_v36 }
 0xb03   :  { %v2127_v38 = vrot.slane %v2126_v28, 1 }
 0xb05   :  { %v2128_v40 = vadd.f32 %v2127_v38, %v2126_v28 }
 0xb07   :  { %v2129_v41 = vmul.f32 0.5, %v2128_v40 }
 0xb09   :  { %v2130_v42 = vadd.f32 1e-05, %v2129_v41 }
 0xb0b   :  { %2605 = vrsqrt.f32 %v2130_v42 }
 0xb18   :  { %v2606_v43 = vpop.eup %2605 }
 0xb19   :  { %v2132_v44 = vmul.f32 %v2606_v43, %v2120_v33 }
 0xb1b   :  { %2549 = vmatmul.mubr.msk.f32.vlgmr.msra.gmra.mxu1 %vm2148_vm13, %v2132_v44 }
 0xbdb   :  { %v2218_v46 = vpop.f32.mrf.mxu1 }
 0xbdc   :  { %v2219_v47 = vadd.f32 %v2322_v45, %v2218_v46 }
 0xbdd   :  { %v2550_v48 = vpop.f32.mrf.mxu1 }
 0xbde   :  { %vm2222_vm8 = vcmp.gt.f32.partialorder %v2219_v47, 0.0  ;;  %v2223_v49 = vmul.f32 0.01, %v2219_v47 }
 0xbe0   :  { %v2224_v50 = vsel %vm2222_vm8, %v2219_v47, %v2223_v49 }
 0xbe1   :  { %v2226_v51 = vsel %vm2225_vm10, %v2224_v50, 0.0 }
 0xbe2   :  { %v2227_v52 = vrot.slane %v2226_v51, 4 }
 0xbe4   :  { %v2228_v53 = vadd.f32 %v2227_v52, %v2226_v51 }
 0xbe6   :  { %v2229_v54 = vrot.slane %v2228_v53, 2 }
 0xbe8   :  { %v2230_v55 = vadd.f32 %v2229_v54, %v2228_v53 }
 0xbea   :  { %v2231_v56 = vrot.slane %v2230_v55, 1 }
 0xbec   :  { %v2232_v57 = vadd.f32 %v2231_v56, %v2230_v55 }
 0xbee   :  { %v2233_v58 = vmul.f32 0.5, %v2232_v57 }
 0xbf0   :  { %v2234_v59 = vsub.f32 %v2224_v50, %v2233_v58 }
 0xbf2   :  { %v2235_v62 = vmul.f32 %v2234_v59, %v2234_v59 }
 0xbf4   :  { %v2236_v63 = vsel %vm2225_vm10, %v2235_v62, 0.0 }
 0xbf5   :  { %v2237_v0 = vrot.slane %v2236_v63, 4 }
 0xbf7   :  { %v2238_v1 = vadd.f32 %v2237_v0, %v2236_v63 }
 0xbf9   :  { %v2239_v61 = vrot.slane %v2238_v1, 2 }
 0xbfb   :  { %v2240_v3 = vadd.f32 %v2239_v61, %v2238_v1 }
 0xbfd   :  { %v2241_v4 = vrot.slane %v2240_v3, 1 }
 0xbff   :  { %v2242_v5 = vadd.f32 %v2241_v4, %v2240_v3 }
 0xc01   :  { %v2243_v6 = vmul.f32 0.5, %v2242_v5 }
 0xc03   :  { %v2244_v60 = vadd.f32 1e-05, %v2243_v6 }
 0xc05   :  { %2607 = vrsqrt.f32 %v2244_v60 }
 0xc12   :  { %v2608_v7 = vpop.eup %2607 }
 0xc13   :  { %v2246_v8 = vmul.f32 %v2608_v7, %v2234_v59 }
 0xc15   :  { %v2247_v9 = vsel %vm2225_vm10, %v2246_v8, -inf }
 0xc16   :  { %2248 = vmax.xlane.f32.xlu1 %v2247_v9 }
 0xc9f   :  { %v2249_v10 = vpop.xlane.xlu1 %2248 }
 0xca0   :  { %v2250_v11 = vsub.f32 %v2246_v8, %v2249_v10 }
 0xca2   :  { %v2251_v12 = vmul.f32 1.442695, %v2250_v11 }
 0xca4   :  { %2609 = vpow2.f32 %v2251_v12 }
 0xcb1   :  { %v2610_v39 = vpop.eup %2609 }
 0xcb2   :  { %v2253_v13 = vsel %vm2225_vm10, %v2610_v39, 0.0 }
 0xcb3   :  { %2254 = vadd.xlane.f32.xlu0 %v2253_v13 }
 0xd3c   :  { %v2255_v14 = vpop.xlane.xlu0 %2254 }
 0xd3d   :  { %2611 = vrcp.f32 %v2255_v14 }
 0xd4a   :  { %v2612_v15 = vpop.eup %2611 }
 0xd4b   :  { %v2257_v16 = vmul.f32 %v2612_v15, %v2610_v39 }
 0xd4d   :  { %2258 = vst.msk [vmem:[#allocation4] sm:$0x3] %vm2225_vm10, %v2257_v16 }
 0xd4e   :  { %2624 = shalt.err (!%p2621_p4)
}
 0xd4f   :  { %2268 = dma.vmem_to_hbm [thread:$0]  %s2266_s3, 32, %s3887_s22, [#allocation5]  }
 0xd50   :  { %2633 = dma.done.wait [#allocation5], 32  }
 0xd51   :  { %2634 = vsyncadd [#allocation5], 4294967264 }
 0xd52   :  { %2272 = vsyncpa [#allocation5], 1 }

</bundles_post_ra>
